<compile_context>
chip_gen: v7x
topology: tpu7x:2x2x1
jax: 0.10.0
libtpu: 0.0.40
codegen_flags: <defaults>
</compile_context>

<pallas_src>
import jax
import jax.numpy as jnp
from jax import lax
from jax.experimental import pallas as pl
from jax.experimental.pallas import tpu as pltpu

BN_EPS = 1e-5
_LANE = 128


def _round_up(n, m):
    return (n + m - 1) // m * m


def _pad_to(a, shape):
    pads = [(0, t - s) for s, t in zip(a.shape, shape)]
    if all(p == (0, 0) for p in pads):
        return a
    return jnp.pad(a, pads)


def _vmem_limit_bytes():
    # ~75% of physical VMEM: ~96 MiB on v5e/v6e (128 MiB), ~48 MiB on v7x (64 MiB).
    try:
        phys = int(pltpu.get_tpu_info().vmem_capacity_bytes)
    except Exception:
        phys = 64 << 20  # conservative fallback (v7x-sized)
    return (phys * 3) // 4


def _prefer_even_grid():
    # v7x has 2 TensorCores per chip; an even batch grid keeps both busy.
    try:
        return "7" in jax.devices()[0].device_kind
    except Exception:
        return False


def _choose_batch_tile(B, Dp, Hp, *, x_bytes, c_bytes, h_bytes, out_bytes, cap):
    """Largest batch tile in {1024, 512, 256, 128} that fits VMEM (double-buffered
    block estimate) and, if possible, keeps a >=2-step grid for pipelining /
    megacore sharding. Tiny batches fall back to a single padded block."""

    def fits(tb):
        p1 = 2 * (tb * Dp * x_bytes + Dp * Hp * c_bytes + tb * Hp * h_bytes + 2 * Hp * 4)
        p2 = 2 * (tb * Hp * h_bytes + 2 * Hp * 4 + Hp * Dp * c_bytes + Dp * 4
                  + tb * Dp * out_bytes)
        return max(p1, p2) + (4 << 20) <= cap

    for want_multi_step in (True, False):
        for tb in (1024, 512, 256, 128):
            if tb > B:
                continue
            if want_multi_step and pl.cdiv(B, tb) < 2:
                continue
            if fits(tb):
                return tb
    if B < 128:
        return max(_round_up(B, 8), 8)
    return 128


# ---------------- pass 1: h = x @ W1 and per-tile BN partial stats ----------------
def _matmul_stats_kernel(x_ref, w1_ref, h_ref, stats_ref):
    # x_ref: (TB, Dp) input dtype (cast to bf16 here on the fast path);
    # w1_ref: (Dp, Hp) bf16, grid-invariant.
    x = x_ref[...].astype(w1_ref.dtype)
    h = jnp.dot(x, w1_ref[...], preferred_element_type=jnp.float32)   # (TB, Hp) f32
    h_ref[...] = h.astype(h_ref.dtype)          # bf16 intermediate -> halves h HBM traffic
    # Per-tile BN partial statistics, computed from the f32 accumulator.
    stats_ref[0:1, :] = jnp.sum(h, axis=0, keepdims=True)
    stats_ref[1:2, :] = jnp.sum(h * h, axis=0, keepdims=True)


# ------------- pass 2: out = relu(h * scale + shift) @ W2 + b2 -------------
def _bn_relu_matmul_kernel(h_ref, ss_ref, w2_ref, b2_ref, o_ref):
    h = h_ref[...].astype(jnp.float32)          # (TB, Hp) bf16 -> f32 VPU math
    scale = ss_ref[0:1, :]                      # gamma * rsqrt(var + eps)
    shift = ss_ref[1:2, :]                      # beta - mean * scale
    a = jnp.maximum(h * scale + shift, 0.0)     # BN + ReLU in f32
    out = jnp.dot(a.astype(w2_ref.dtype), w2_ref[...],   # bf16 MXU, f32 accumulate
                  preferred_element_type=jnp.float32)
    o_ref[...] = (out + b2_ref[...]).astype(o_ref.dtype)


def predictor_forward(x, w1, b1, gamma, beta, w2, b2, *,
                      compute_dtype=jnp.bfloat16, out_dtype=None, batch_tile=None):
    """Fused Predictor forward (num_linear_layers=2, batch_norm=True, bias=True).

    x: (B, D); w1: (D, H); w2: (H, D); gamma/beta/b1: (H,); b2: (D,).
    NOTE: b1 is dropped -- valid ONLY because BatchNorm (training-mode batch
    statistics) subtracts the batch mean of (x @ W1 + b1), making b1 a no-op.
    """
    del b1

    B, D = x.shape
    H = w1.shape[1]
    Dp, Hp = _round_up(D, _LANE), _round_up(H, _LANE)

    cdt = jnp.dtype(compute_dtype)
    cb = cdt.itemsize
    odt = jnp.dtype(out_dtype) if out_dtype is not None else x.dtype
    hdt = jnp.bfloat16
    hb = jnp.dtype(hdt).itemsize

    cap = _vmem_limit_bytes()
    if batch_tile is not None:
        TB = int(batch_tile)
    else:
        TB = _choose_batch_tile(B, Dp, Hp, x_bytes=x.dtype.itemsize, c_bytes=cb,
                                h_bytes=hb, out_bytes=odt.itemsize, cap=cap)
    G = pl.cdiv(B, TB)
    if G > 1 and G % 2 == 1 and _prefer_even_grid():
        G += 1                                  # v7x: even grid -> both TensorCores busy
    Bp = G * TB

    # Fast path: tile-aligned x goes straight to the kernel (cast in VMEM);
    # otherwise zero-pad. Padding is exact: padded feature columns contribute 0
    # through both matmuls / BN, and padded batch rows produce h == 0 (b1 is
    # dropped) so the BN sums are unaffected as long as mean/var divide by the
    # TRUE batch size B (they do, below).
    if (Bp, Dp) == (B, D):
        x_in = x
    else:
        x_in = _pad_to(x.astype(cdt), (Bp, Dp))

    w1q = _pad_to(w1, (Dp, Hp)).astype(cdt)
    w2q = _pad_to(w2, (Hp, Dp)).astype(cdt)
    gamma_p = _pad_to(gamma.reshape(-1).astype(jnp.float32), (Hp,))
    beta_p = _pad_to(beta.reshape(-1).astype(jnp.float32), (Hp,))
    b2p = _pad_to(b2.reshape(1, -1).astype(jnp.float32), (1, Dp))

    # ---- pass 1: h = x @ W1, partial BN stats ----
    h, part_stats = pl.pallas_call(
        _matmul_stats_kernel,
        out_shape=(jax.ShapeDtypeStruct((Bp, Hp), hdt),
                   jax.ShapeDtypeStruct((G, 2, Hp), jnp.float32)),
        grid=(G,),
        in_specs=[pl.BlockSpec((TB, Dp), lambda i: (i, 0)),
                  pl.BlockSpec((Dp, Hp), lambda i: (0, 0))],
        out_specs=(pl.BlockSpec((TB, Hp), lambda i: (i, 0)),
                   pl.BlockSpec((None, 2, Hp), lambda i: (i, 0, 0))),
        compiler_params=pltpu.CompilerParams(
            dimension_semantics=("parallel",),
            vmem_limit_bytes=cap),
        cost_estimate=pl.CostEstimate(
            flops=2 * Bp * Dp * Hp, transcendentals=0,
            bytes_accessed=(Bp * Dp * x_in.dtype.itemsize + Dp * Hp * cb
                            + Bp * Hp * hb + G * 2 * Hp * 4)),
    )(x_in, w1q)

    # ---- tiny JAX glue: reduce partial stats, fold BN into one scale/shift ----
    totals = jnp.sum(part_stats, axis=0)                   # (2, Hp)
    mean = totals[0] / B                                   # TRUE batch size, not Bp
    var = jnp.maximum(totals[1] / B - mean * mean, 0.0)    # biased var (PyTorch BN training)
    scale = gamma_p * lax.rsqrt(var + BN_EPS)
    shift = beta_p - mean * scale
    ss = jnp.stack([scale, shift], axis=0).astype(jnp.float32)   # (2, Hp)

    # ---- pass 2: out = relu(h * scale + shift) @ W2 + b2 ----
    out_p = pl.pallas_call(
        _bn_relu_matmul_kernel,
        out_shape=jax.ShapeDtypeStruct((Bp, Dp), odt),
        grid=(G,),
        in_specs=[pl.BlockSpec((TB, Hp), lambda i: (i, 0)),
                  pl.BlockSpec((2, Hp), lambda i: (0, 0)),
                  pl.BlockSpec((Hp, Dp), lambda i: (0, 0)),
                  pl.BlockSpec((1, Dp), lambda i: (0, 0))],
        out_specs=pl.BlockSpec((TB, Dp), lambda i: (i, 0)),
        compiler_params=pltpu.CompilerParams(
            dimension_semantics=("parallel",),
            vmem_limit_bytes=cap),
        cost_estimate=pl.CostEstimate(
            flops=2 * Bp * Hp * Dp + 3 * Bp * Hp, transcendentals=0,
            bytes_accessed=(Bp * Hp * hb + 2 * Hp * 4 + Hp * Dp * cb + Dp * 4
                            + Bp * Dp * odt.itemsize)),
    )(h, ss, w2q, b2p)

    if (Bp, Dp) == (B, D):
        return out_p
    return out_p[:B, :D]


def reference_forward(x, w1, b1, gamma, beta, w2, b2,
                      compute_dtype=jnp.float32, h_store_dtype=None):
    """Pure-JAX reference of the PyTorch module. `compute_dtype` matches the
    kernel's MXU operand dtype; `h_store_dtype` mimics the bf16 h round-trip."""
    cdt = jnp.dtype(compute_dtype)
    h = jnp.dot(x.astype(cdt), w1.astype(cdt),
                preferred_element_type=jnp.float32) + b1.reshape(1, -1)
    mean = jnp.mean(h, axis=0, keepdims=True)
    var = jnp.mean((h - mean) ** 2, axis=0, keepdims=True)
    if h_store_dtype is not None:
        h = h.astype(h_store_dtype).astype(jnp.float32)
    hn = (h - mean) * lax.rsqrt(var + BN_EPS) * gamma.reshape(1, -1) + beta.reshape(1, -1)
    a = jnp.maximum(hn, 0.0)
    return jnp.dot(a.astype(cdt), w2.astype(cdt),
                   preferred_element_type=jnp.float32) + b2.reshape(1, -1)


if __name__ == "__main__":
    # TODO(synk): only the default config path (num_linear_layers=2, batch_norm=True,
    # bias=True) is implemented; other PredictorConfig variants are out of scope here.
    fwd = jax.jit(predictor_forward,
                  static_argnames=("compute_dtype", "out_dtype", "batch_tile"))

    def run_case(seed, B, DIM, HIDDEN):
        key = jax.random.PRNGKey(seed)
        kx, kw1, kb1, kw2, kb2 = jax.random.split(key, 5)
        x = jax.random.normal(kx, (B, DIM), dtype=jnp.float32)
        # Parameters stored [in, out] (transpose of PyTorch nn.Linear's [out, in]).
        w1 = jax.random.normal(kw1, (DIM, HIDDEN), dtype=jnp.float32) / jnp.sqrt(DIM)
        b1 = jax.random.normal(kb1, (HIDDEN,), dtype=jnp.float32) * 0.01
        gamma = jnp.ones((HIDDEN,), dtype=jnp.float32)   # BatchNorm1d weight init
        beta = jnp.zeros((HIDDEN,), dtype=jnp.float32)   # BatchNorm1d bias init
        w2 = jax.random.normal(kw2, (HIDDEN, DIM), dtype=jnp.float32) / jnp.sqrt(HIDDEN)
        b2 = jax.random.normal(kb2, (DIM,), dtype=jnp.float32) * 0.01

        out = jax.block_until_ready(fwd(x, w1, b1, gamma, beta, w2, b2))
        assert out.shape == (B, DIM)

        # Tight check vs. a reference matched to the kernel's bf16 operands / bf16 h.
        ref_m = reference_forward(x, w1, b1, gamma, beta, w2, b2,
                                  compute_dtype=jnp.bfloat16, h_store_dtype=jnp.bfloat16)
        assert jnp.allclose(out, ref_m, atol=3e-2, rtol=3e-2), \
            f"mismatch vs. bf16-matched reference (B={B}, D={DIM}, H={HIDDEN})"

        # Loose sanity check vs. full-f32 module semantics.
        ref_f32 = reference_forward(x, w1, b1, gamma, beta, w2, b2,
                                    compute_dtype=jnp.float32)
        assert jnp.allclose(out, ref_f32, atol=1.5e-1, rtol=1.5e-1), \
            f"mismatch vs. f32 reference (B={B}, D={DIM}, H={HIDDEN})"

    # Fast path: lane-dense 128-multiples, no padding, 2-step batch grid.
    run_case(0, B=512, DIM=256, HIDDEN=128)
    # Padded path: un-aligned B / D / H exercises zero-padding + true-B statistics.
    run_case(0, B=200, DIM=96, HIDDEN=80)

    print("KERNEL_OK")
</pallas_src>

<mosaic_0001>
module attributes {stable_mosaic.version = 11 : i64} {
  func.func @_matmul_stats_kernel(%arg0: i32, %arg1: memref<256x256xf32, #tpu.memory_space<vmem>>, %arg2: memref<256x128xbf16, #tpu.memory_space<vmem>>, %arg3: memref<256x128xbf16, #tpu.memory_space<vmem>>, %arg4: memref<1x2x128xf32, #tpu.memory_space<vmem>>) attributes {dimension_semantics = [#tpu.dimension_semantics<parallel>], iteration_bounds = array<i64: 2>, scalar_prefetch = 0 : i64, scratch_operands = 0 : i64, tpu.core_type = #tpu.core_type<tc>, window_params = [{transform_indices = @transform_0, window_bounds = array<i64: 256, 256>}, {pipeline_mode = #tpu.pipeline_mode<synchronous>, transform_indices = @transform_1, window_bounds = array<i64: 256, 128>}, {transform_indices = @transform_2, window_bounds = array<i64: 256, 128>}, {transform_indices = @transform_3, window_bounds = array<i64: 1, 2, 128>}]} {
    %c0 = arith.constant 0 : index
    %c0_0 = arith.constant 0 : index
    %0 = vector.load %arg1[%c0, %c0_0] : memref<256x256xf32, #tpu.memory_space<vmem>>, vector<256x256xf32>
    %1 = arith.truncf %0 : vector<256x256xf32> to vector<256x256xbf16>
    %c0_1 = arith.constant 0 : index
    %c0_2 = arith.constant 0 : index
    %2 = vector.load %arg2[%c0_1, %c0_2] : memref<256x128xbf16, #tpu.memory_space<vmem>>, vector<256x128xbf16>
    %cst = arith.constant dense<0.000000e+00> : vector<256x128xf32>
    %3 = tpu.matmul %1, %2, %cst {dimension_numbers = #tpu.dot_dimension_numbers<[1], [0], [0], [1], [0, 0, 1, 1], [], []>} : vector<256x256xbf16>, vector<256x128xbf16>, vector<256x128xf32> -> vector<256x128xf32>
    %4 = arith.truncf %3 : vector<256x128xf32> to vector<256x128xbf16>
    %c0_3 = arith.constant 0 : index
    %c0_4 = arith.constant 0 : index
    %5 = vector.load %arg3[%c0_3, %c0_4] : memref<256x128xbf16, #tpu.memory_space<vmem>>, vector<256x128xbf16>
    tpu.vector_store %arg3[%c0_3, %c0_4], %4 {strides = array<i32>} : memref<256x128xbf16, #tpu.memory_space<vmem>>, vector<256x128xbf16>,
    %cst_5 = arith.constant dense<0.000000e+00> : vector<128xf32>
    %6 = vector.multi_reduction <add>, %3, %cst_5 [0] : vector<256x128xf32> to vector<128xf32>
    %7 = vector.shape_cast %6 : vector<128xf32> to vector<1x128xf32>
    %c0_6 = arith.constant 0 : index
    %c0_7 = arith.constant 0 : index
    %c0_8 = arith.constant 0 : index
    %8 = vector.load %arg4[%c0_6, %c0_7, %c0_8] : memref<1x2x128xf32, #tpu.memory_space<vmem>>, vector<1x1x128xf32>
    %9 = vector.shape_cast %8 : vector<1x1x128xf32> to vector<1x128xf32>
    %10 = vector.shape_cast %7 : vector<1x128xf32> to vector<1x1x128xf32>
    tpu.vector_store %arg4[%c0_6, %c0_7, %c0_8], %10 {strides = array<i32>} : memref<1x2x128xf32, #tpu.memory_space<vmem>>, vector<1x1x128xf32>,
    %11 = arith.mulf %3, %3 : vector<256x128xf32>
    %cst_9 = arith.constant dense<0.000000e+00> : vector<128xf32>
    %12 = vector.multi_reduction <add>, %11, %cst_9 [0] : vector<256x128xf32> to vector<128xf32>
    %13 = vector.shape_cast %12 : vector<128xf32> to vector<1x128xf32>
    %c0_10 = arith.constant 0 : index
    %c1 = arith.constant 1 : index
    %c0_11 = arith.constant 0 : index
    %14 = vector.load %arg4[%c0_10, %c1, %c0_11] : memref<1x2x128xf32, #tpu.memory_space<vmem>>, vector<1x1x128xf32>
    %15 = vector.shape_cast %14 : vector<1x1x128xf32> to vector<1x128xf32>
    %16 = vector.shape_cast %13 : vector<1x128xf32> to vector<1x1x128xf32>
    tpu.vector_store %arg4[%c0_10, %c1, %c0_11], %16 {strides = array<i32>} : memref<1x2x128xf32, #tpu.memory_space<vmem>>, vector<1x1x128xf32>,
    return
  }
  func.func @transform_0(%arg0: i32) -> (i32, i32) {
    %c0_i32 = arith.constant 0 : i32
    %c0_i32_0 = arith.constant 0 : i32
    return %arg0, %c0_i32 : i32, i32
  }
  func.func @transform_1(%arg0: i32) -> (i32, i32) {
    %c0_i32 = arith.constant 0 : i32
    %c0_i32_0 = arith.constant 0 : i32
    %c0_i32_1 = arith.constant 0 : i32
    return %c0_i32, %c0_i32_0 : i32, i32
  }
  func.func @transform_2(%arg0: i32) -> (i32, i32) {
    %c0_i32 = arith.constant 0 : i32
    %c0_i32_0 = arith.constant 0 : i32
    return %arg0, %c0_i32 : i32, i32
  }
  func.func @transform_3(%arg0: i32) -> (i32, i32, i32) {
    %c0_i32 = arith.constant 0 : i32
    %c0_i32_0 = arith.constant 0 : i32
    %c0_i32_1 = arith.constant 0 : i32
    return %arg0, %c0_i32, %c0_i32_0 : i32, i32, i32
  }
}

module attributes {stable_mosaic.version = 11 : i64} {
  func.func @_bn_relu_matmul_kernel(%arg0: i32, %arg1: memref<256x128xbf16, #tpu.memory_space<vmem>>, %arg2: memref<2x128xf32, #tpu.memory_space<vmem>>, %arg3: memref<128x256xbf16, #tpu.memory_space<vmem>>, %arg4: memref<1x256xf32, #tpu.memory_space<vmem>>, %arg5: memref<256x256xf32, #tpu.memory_space<vmem>>) attributes {dimension_semantics = [#tpu.dimension_semantics<parallel>], iteration_bounds = array<i64: 2>, scalar_prefetch = 0 : i64, scratch_operands = 0 : i64, tpu.core_type = #tpu.core_type<tc>, window_params = [{transform_indices = @transform_0, window_bounds = array<i64: 256, 128>}, {pipeline_mode = #tpu.pipeline_mode<synchronous>, transform_indices = @transform_1, window_bounds = array<i64: 2, 128>}, {pipeline_mode = #tpu.pipeline_mode<synchronous>, transform_indices = @transform_2, window_bounds = array<i64: 128, 256>}, {pipeline_mode = #tpu.pipeline_mode<synchronous>, transform_indices = @transform_3, window_bounds = array<i64: 1, 256>}, {transform_indices = @transform_4, window_bounds = array<i64: 256, 256>}]} {
    %c0 = arith.constant 0 : index
    %c0_0 = arith.constant 0 : index
    %0 = vector.load %arg1[%c0, %c0_0] : memref<256x128xbf16, #tpu.memory_space<vmem>>, vector<256x128xbf16>
    %1 = arith.extf %0 : vector<256x128xbf16> to vector<256x128xf32>
    %c0_1 = arith.constant 0 : index
    %c0_2 = arith.constant 0 : index
    %2 = vector.load %arg2[%c0_1, %c0_2] : memref<2x128xf32, #tpu.memory_space<vmem>>, vector<1x128xf32>
    %c1 = arith.constant 1 : index
    %c0_3 = arith.constant 0 : index
    %3 = vector.load %arg2[%c1, %c0_3] : memref<2x128xf32, #tpu.memory_space<vmem>>, vector<1x128xf32>
    %4 = vector.broadcast %2 : vector<1x128xf32> to vector<256x128xf32>
    %5 = arith.mulf %1, %4 : vector<256x128xf32>
    %6 = vector.broadcast %3 : vector<1x128xf32> to vector<256x128xf32>
    %7 = arith.addf %5, %6 : vector<256x128xf32>
    %cst = arith.constant 0.000000e+00 : f32
    %8 = vector.broadcast %cst : f32 to vector<256x128xf32>
    %9 = arith.maximumf %7, %8 : vector<256x128xf32>
    %10 = arith.truncf %9 : vector<256x128xf32> to vector<256x128xbf16>
    %c0_4 = arith.constant 0 : index
    %c0_5 = arith.constant 0 : index
    %11 = vector.load %arg3[%c0_4, %c0_5] : memref<128x256xbf16, #tpu.memory_space<vmem>>, vector<128x256xbf16>
    %cst_6 = arith.constant dense<0.000000e+00> : vector<256x256xf32>
    %12 = tpu.matmul %10, %11, %cst_6 {dimension_numbers = #tpu.dot_dimension_numbers<[1], [0], [0], [1], [0, 0, 1, 1], [], []>} : vector<256x128xbf16>, vector<128x256xbf16>, vector<256x256xf32> -> vector<256x256xf32>
    %c0_7 = arith.constant 0 : index
    %c0_8 = arith.constant 0 : index
    %13 = vector.load %arg4[%c0_7, %c0_8] : memref<1x256xf32, #tpu.memory_space<vmem>>, vector<1x256xf32>
    %14 = vector.broadcast %13 : vector<1x256xf32> to vector<256x256xf32>
    %15 = arith.addf %12, %14 : vector<256x256xf32>
    %c0_9 = arith.constant 0 : index
    %c0_10 = arith.constant 0 : index
    %16 = vector.load %arg5[%c0_9, %c0_10] : memref<256x256xf32, #tpu.memory_space<vmem>>, vector<256x256xf32>
    tpu.vector_store %arg5[%c0_9, %c0_10], %15 {strides = array<i32>} : memref<256x256xf32, #tpu.memory_space<vmem>>, vector<256x256xf32>,
    return
  }
  func.func @transform_0(%arg0: i32) -> (i32, i32) {
    %c0_i32 = arith.constant 0 : i32
    %c0_i32_0 = arith.constant 0 : i32
    return %arg0, %c0_i32 : i32, i32
  }
  func.func @transform_1(%arg0: i32) -> (i32, i32) {
    %c0_i32 = arith.constant 0 : i32
    %c0_i32_0 = arith.constant 0 : i32
    %c0_i32_1 = arith.constant 0 : i32
    return %c0_i32, %c0_i32_0 : i32, i32
  }
  func.func @transform_2(%arg0: i32) -> (i32, i32) {
    %c0_i32 = arith.constant 0 : i32
    %c0_i32_0 = arith.constant 0 : i32
    %c0_i32_1 = arith.constant 0 : i32
    return %c0_i32, %c0_i32_0 : i32, i32
  }
  func.func @transform_3(%arg0: i32) -> (i32, i32) {
    %c0_i32 = arith.constant 0 : i32
    %c0_i32_0 = arith.constant 0 : i32
    %c0_i32_1 = arith.constant 0 : i32
    return %c0_i32, %c0_i32_0 : i32, i32
  }
  func.func @transform_4(%arg0: i32) -> (i32, i32) {
    %c0_i32 = arith.constant 0 : i32
    %c0_i32_0 = arith.constant 0 : i32
    return %arg0, %c0_i32 : i32, i32
  }
}

</mosaic_0001>

<bundles_post_ra>
// kernel: predictor_forward.3
= control target key start
LH: loop header
LB: loop body
LE: loop exit
PB: predicated region body
PF: predicated region fallthrough
CT: control target
= control target key end

     0   :  { %9 = vsyncpa [#allocation3], 0  ;;  %s1515_s0 = inlined_call_operand.vmem [shape: bf16[512,128], index: 0, kind: input, shape index: {}]   ;;  %s1516_s1 = inlined_call_operand.vmem [shape: f32[2,128], index: 1, kind: input, shape index: {}]   ;;  %s1517_s2 = inlined_call_operand.vmem [shape: bf16[128,256], index: 2, kind: input, shape index: {}]   ;;  %s1518_s3 = inlined_call_operand.vmem [shape: f32[1,256], index: 3, kind: input, shape index: {}]   ;;  %s1519_s4 = inlined_call_operand.hbm [shape: f32[512,256], index: 4, kind: output, shape index: {}]  }
   0x1   :  { %11 = vsyncpa [#allocation3 + $0x1], 0  ;;  %s1115_s15 = smov 0   ;;  %s1117_s16 = smov 0  }
   0x2   :  { %s1119_s17 = smov 0   ;;  %s1121_s18 = smov 0  }
   0x3 LB: > { %s1136_s19 = sadd.s32 4294967295, %s1084_s18   ;;  %s828_s20 = sadd.s32 4294967294, %s1084_s18   ;;  %s1084_s18 = sphi %s1121_s18, %s1525_s18   ;;  %s1080_s17 = sphi %s1119_s17, %s1524_s17   ;;  %s1076_s16 = sphi %s1117_s16, %s1523_s16   ;;  %s1072_s15 = sphi %s1115_s15, %s1522_s15  }
   0x4   : > { %s1140_s21 = sadd.s32 1, %s1084_s18   ;;  %s113_s22 = sadd.s32 1, %s1080_s17 }
   0x5   : > { %s110_s23 = ssub.s32 %s1084_s18, %s1140_s21  ;;  %p123_p0 = scmp.ne.s32.totalorder %s1080_s17, %s1076_s16 }
   0x6   : > { %p111_p1 = scmp.eq.s32.totalorder %s110_s23, 0  ;;  %p124_p2 = scmp.eq.s32.totalorder %s1136_s19, 1 }
   0x7   : > { %p129_p3 = scmp.ne.s32.totalorder %s1076_s16, %s1072_s15  ;;  %p130_p4 = scmp.eq.s32.totalorder %s828_s20, 1 }
   0x8   : > { %s1151_s24 = scalar_select %p111_p1, %s1080_s17, %s113_s22  }
   0x9   : > { %p1153_p5 = por %p124_p2, %p123_p0  ;;  %p1157_p6 = por %p130_p4, %p129_p3 }
   0xa   : > { %p831_p7 = scmp.ge.s32.totalorder %s1084_s18, 1  ;;  %p166_p8 = scmp.lt.s32.totalorder %s1084_s18, 3 }
   0xc   : > { %p167_p9 = pnand %p831_p7, %p166_p8 }
   0xd   : > { %v998_v0 = vld [vmem:[%s1517_s2 + $0x4] ss:$8 sps:$4 sm:$0xff] (!%p167_p9)   ;;  %s833_s29 = sshll.u32 (!%p167_p9), %s1136_s19, 5  ;;  %v1000_v1 = vld [vmem:[%s1517_s2] ss:$8 sps:$4 sm:$0xff] (!%p167_p9)   ;;  %v1086_v2 = vmov (!%p167_p9), 0  }
   0xe   : > { %170 = sbr.rel (%p167_p9) target bundleno = 335 (0x14f), region = 36  ;;  %526 = vmatprep.mubr.bf16.mxu0 (!%p167_p9), %v1086_v2  ;;  %606 = vmatprep.mubr.bf16.mxu1 (!%p167_p9), %v1086_v2  ;;  %p193_p10 = scmp.lt.s32.totalorder (!%p167_p9), %s833_s29, 63  ;;  %v1001_v3 = vld [vmem:[%s1517_s2 + $0x14] ss:$8 sps:$4 sm:$0xff] (!%p167_p9)   ;;  %v1003_v4 = vld [vmem:[%s1517_s2 + $0x10] ss:$8 sps:$4 sm:$0xff] (!%p167_p9)  }
   0xf   : > { %494 = vmatprep.subr.bf16.mxu0 (!%p167_p9), %v998_v0  ;;  %940 = vmatprep.subr.bf16.mxu1 (!%p167_p9), %v998_v0  ;;  %v1004_v5 = vld [vmem:[%s1517_s2 + $0x24] ss:$8 sps:$4 sm:$0xff] (!%p167_p9)   ;;  %v1006_v6 = vld [vmem:[%s1517_s2 + $0x20] ss:$8 sps:$4 sm:$0xff] (!%p167_p9)   ;;  %v1007_v7 = vld [vmem:[%s1517_s2 + $0x34] ss:$8 sps:$4 sm:$0xff] (!%p167_p9)  }
  0x10   : > { %495 = vmatpush1.bf16.msra.mxu0 (!%p167_p9), %v1000_v1  ;;  %948 = vmatpush1.bf16.msra.mxu1 (!%p167_p9), %v1000_v1  ;;  %v1009_v9 = vld [vmem:[%s1517_s2 + $0x30] ss:$8 sps:$4 sm:$0xff] (!%p167_p9)   ;;  %v1010_v11 = vld [vmem:[%s1517_s2 + $0x44] ss:$8 sps:$4 sm:$0xff] (!%p167_p9)   ;;  %v1203_v14 = vld [vmem:[%s1516_s1] ss:$0 sm:$0xff] (!%p167_p9) }
  0x11   : > { %496 = vmatprep.subr.bf16.mxu0 (!%p167_p9), %v1001_v3  ;;  %941 = vmatprep.subr.bf16.mxu1 (!%p167_p9), %v1001_v3  ;;  %v1012_v17 = vld [vmem:[%s1517_s2 + $0x40] ss:$8 sps:$4 sm:$0xff] (!%p167_p9)   ;;  %v1013_v18 = vld [vmem:[%s1517_s2 + $0x54] ss:$8 sps:$4 sm:$0xff] (!%p167_p9)   ;;  %v1015_v26 = vld [vmem:[%s1517_s2 + $0x50] ss:$8 sps:$4 sm:$0xff] (!%p167_p9)  }
  0x12   : > { %v1217_v22 = vld [vmem:[%s1516_s1 + $0x1] ss:$0 sm:$0xff] (!%p167_p9)  ;;  %v1016_v27 = vld [vmem:[%s1517_s2 + $0x64] ss:$8 sps:$4 sm:$0xff] (!%p167_p9)   ;;  %v1019_v37 = vld [vmem:[%s1517_s2 + $0x74] ss:$8 sps:$4 sm:$0xff] (!%p167_p9)  }
  0x13   : > { %v1018_v36 = vld [vmem:[%s1517_s2 + $0x60] ss:$8 sps:$4 sm:$0xff] (!%p167_p9)   ;;  %v1021_v47 = vld [vmem:[%s1517_s2 + $0x70] ss:$8 sps:$4 sm:$0xff] (!%p167_p9)   ;;  %s860_s13 = sshll.u32 (!%p167_p9), %s1136_s19, 13 }
  0x14   : > { %497 = vmatpush1.bf16.msra.mxu0 (!%p167_p9), %v1003_v4  ;;  %949 = vmatpush1.bf16.msra.mxu1 (!%p167_p9), %v1003_v4  ;;  %s1460_s22 = scalar_lea.hbm (!%p167_p9), %s1519_s4, %s860_s13 }
  0x15   : > { %s1527_s29 = smov (!%p193_p10, %s833_s29), 63  ;;  %498 = vmatprep.subr.bf16.mxu0 %v1004_v5  ;;  %942 = vmatprep.subr.bf16.mxu1 %v1004_v5 }
  0x16   : > { %s834_s12 = sshll.u32 %s1527_s29, 2  ;;  %s1087_s29 = smov [#allocation2]  }
  0x17   : > { %s1187_s23 = scalar_lea.vmem %s1515_s0, %s834_s12  ;;  %s1026_s30 = sshll.u32 %s1087_s29, 4  ;;  %s1027_s30 = int_to_ptr.vmem [resolvable:$false] %s1026_s30 }
  0x18   : > { %v862_v8 = vld [vmem:[%s1187_s23] sm:$0xff]   ;;  %499 = vmatpush1.bf16.msra.mxu0 %v1006_v6  ;;  %950 = vmatpush1.bf16.msra.mxu1 %v1006_v6  ;;  %v925_v21 = vld [vmem:[%s1187_s23 + $0x8] sm:$0xff]   ;;  %v926_v43 = vld [vmem:[%s1187_s23 + $0x10] sm:$0xff]   ;;  %s1028_s5 = scalar_lea.vmem %s1027_s30, 16384 }
  0x19   : > { %v932_v10 = vld [vmem:[%s1187_s23 + $0x40] sm:$0xff]   ;;  %500 = vmatprep.subr.bf16.mxu0 %v1007_v7  ;;  %943 = vmatprep.subr.bf16.mxu1 %v1007_v7  ;;  %v863_v12 = vunpack.c.l.bf16 %v862_v8  ;;  %v864_v13 = vunpack.c.h.bf16 %v862_v8  ;;  %v933_v25 = vld [vmem:[%s1187_s23 + $0x48] sm:$0xff]   ;;  %v867_v28 = vunpack.c.l.bf16 %v925_v21  ;;  %v868_v31 = vunpack.c.h.bf16 %v925_v21  ;;  %v934_v48 = vld [vmem:[%s1187_s23 + $0x50] sm:$0xff]  }
  0x1a   : > { %v895_v15 = vunpack.c.l.bf16 %v932_v10  ;;  %v896_v16 = vunpack.c.h.bf16 %v932_v10  ;;  %v899_v32 = vunpack.c.l.bf16 %v933_v25  ;;  %v900_v35 = vunpack.c.h.bf16 %v933_v25  ;;  %v927_v63 = vld [vmem:[%s1187_s23 + $0x18] sm:$0xff]  }
  0x1b   : > { %v270_v19 = vmul.f32 %v863_v12, %v1203_v14  ;;  %v271_v20 = vmul.f32 %v864_v13, %v1203_v14  ;;  %v272_v38 = vmul.f32 %v867_v28, %v1203_v14  ;;  %v273_v41 = vmul.f32 %v868_v31, %v1203_v14  ;;  %v935_v5 = vld [vmem:[%s1187_s23 + $0x58] sm:$0xff]  }
  0x1c   : > { %501 = vmatpush1.bf16.msra.mxu0 %v1009_v9  ;;  %951 = vmatpush1.bf16.msra.mxu1 %v1009_v9  ;;  %v286_v23 = vmul.f32 %v895_v15, %v1203_v14  ;;  %v287_v24 = vmul.f32 %v896_v16, %v1203_v14  ;;  %v288_v42 = vmul.f32 %v899_v32, %v1203_v14  ;;  %v871_v49 = vunpack.c.l.bf16 %v926_v43 }
  0x1d   : > { %502 = vmatprep.subr.bf16.mxu0 %v1010_v11  ;;  %944 = vmatprep.subr.bf16.mxu1 %v1010_v11  ;;  %v306_v29 = vadd.f32 %v1217_v22, %v270_v19  ;;  %v307_v30 = vadd.f32 %v1217_v22, %v271_v20  ;;  %v289_v46 = vmul.f32 %v900_v35, %v1203_v14  ;;  %v872_v50 = vunpack.c.h.bf16 %v926_v43 }
  0x1e   : > { %v322_v33 = vadd.f32 %v1217_v22, %v286_v23  ;;  %v323_v34 = vadd.f32 %v1217_v22, %v287_v24  ;;  %v308_v52 = vadd.f32 %v1217_v22, %v272_v38  ;;  %v309_v53 = vadd.f32 %v1217_v22, %v273_v41 }
  0x1f   : > { %v338_v39 = vmax.f32 %v306_v29, 0.0  ;;  %v339_v40 = vmax.f32 %v307_v30, 0.0  ;;  %v324_v54 = vadd.f32 %v1217_v22, %v288_v42  ;;  %v325_v56 = vadd.f32 %v1217_v22, %v289_v46  ;;  %v929_v42 = vld [vmem:[%s1187_s23 + $0x28] sm:$0xff]  }
  0x20   : > { %503 = vmatpush1.bf16.msra.mxu0 %v1012_v17  ;;  %952 = vmatpush1.bf16.msra.mxu1 %v1012_v17  ;;  %v354_v44 = vmax.f32 %v322_v33, 0.0  ;;  %v355_v45 = vmax.f32 %v323_v34, 0.0  ;;  %v903_v57 = vunpack.c.l.bf16 %v934_v48  ;;  %v904_v58 = vunpack.c.h.bf16 %v934_v48 }
  0x21   : > { %504 = vmatprep.subr.bf16.mxu0 %v1013_v18  ;;  %945 = vmatprep.subr.bf16.mxu1 %v1013_v18  ;;  %v370_v51 = vpack.c.bf16 %v339_v40, %v338_v39  ;;  %v274_v59 = vmul.f32 %v871_v49, %v1203_v14  ;;  %v275_v60 = vmul.f32 %v872_v50, %v1203_v14  ;;  %v340_v61 = vmax.f32 %v308_v52, 0.0 }
  0x22   : > { %v378_v55 = vpack.c.bf16 %v355_v45, %v354_v44  ;;  %v341_v62 = vmax.f32 %v309_v53, 0.0  ;;  %v356_v0 = vmax.f32 %v324_v54, 0.0  ;;  %v357_v1 = vmax.f32 %v325_v56, 0.0 }
  0x23   : > { %v290_v3 = vmul.f32 %v903_v57, %v1203_v14  ;;  %v291_v4 = vmul.f32 %v904_v58, %v1203_v14  ;;  %v310_v6 = vadd.f32 %v1217_v22, %v274_v59  ;;  %v311_v7 = vadd.f32 %v1217_v22, %v275_v60 }
  0x24   : > { %505 = vmatpush1.bf16.msra.mxu0 %v1015_v26  ;;  %953 = vmatpush1.bf16.msra.mxu1 %v1015_v26  ;;  %v875_v8 = vunpack.c.l.bf16 %v927_v63  ;;  %v371_v9 = vpack.c.bf16 %v341_v62, %v340_v61  ;;  %v876_v10 = vunpack.c.h.bf16 %v927_v63  ;;  %v907_v11 = vunpack.c.l.bf16 %v935_v5  ;;  %v928_v26 = vld [vmem:[%s1187_s23 + $0x20] sm:$0xff]   ;;  %v930_v62 = vld [vmem:[%s1187_s23 + $0x30] sm:$0xff]  }
  0x25   : > { %506 = vmatprep.subr.bf16.mxu0 %v1016_v27  ;;  %946 = vmatprep.subr.bf16.mxu1 %v1016_v27  ;;  %v379_v12 = vpack.c.bf16 %v357_v1, %v356_v0  ;;  %v326_v13 = vadd.f32 %v1217_v22, %v290_v3  ;;  %v327_v15 = vadd.f32 %v1217_v22, %v291_v4  ;;  %v908_v16 = vunpack.c.h.bf16 %v935_v5  ;;  %v936_v27 = vld [vmem:[%s1187_s23 + $0x60] sm:$0xff]   ;;  %v938_v4 = vld [vmem:[%s1187_s23 + $0x70] sm:$0xff]  }
  0x26   : > { %v342_v17 = vmax.f32 %v310_v6, 0.0  ;;  %v343_v18 = vmax.f32 %v311_v7, 0.0  ;;  %v276_v19 = vmul.f32 %v875_v8, %v1203_v14  ;;  %v277_v20 = vmul.f32 %v876_v10, %v1203_v14 }
  0x27   : > { %v292_v21 = vmul.f32 %v907_v11, %v1203_v14  ;;  %v358_v23 = vmax.f32 %v326_v13, 0.0  ;;  %v359_v24 = vmax.f32 %v327_v15, 0.0  ;;  %v293_v25 = vmul.f32 %v908_v16, %v1203_v14 }
  0x28   : > { %507 = vmatpush1.bf16.msra.mxu0 %v1018_v36  ;;  %954 = vmatpush1.bf16.msra.mxu1 %v1018_v36  ;;  %v372_v28 = vpack.c.bf16 %v343_v18, %v342_v17  ;;  %v312_v29 = vadd.f32 %v1217_v22, %v276_v19  ;;  %v313_v30 = vadd.f32 %v1217_v22, %v277_v20  ;;  %v879_v32 = vunpack.c.l.bf16 %v928_v26 }
  0x29   : > { %508 = vmatprep.subr.bf16.mxu0 %v1019_v37  ;;  %947 = vmatprep.subr.bf16.mxu1 %v1019_v37  ;;  %v328_v31 = vadd.f32 %v1217_v22, %v292_v21  ;;  %v880_v33 = vunpack.c.h.bf16 %v928_v26  ;;  %v380_v34 = vpack.c.bf16 %v359_v24, %v358_v23  ;;  %v329_v35 = vadd.f32 %v1217_v22, %v293_v25  ;;  %v931_v25 = vld [vmem:[%s1187_s23 + $0x38] sm:$0xff]  }
  0x2a   : > { %v911_v36 = vunpack.c.l.bf16 %v936_v27  ;;  %v912_v37 = vunpack.c.h.bf16 %v936_v27  ;;  %v344_v38 = vmax.f32 %v312_v29, 0.0  ;;  %v345_v39 = vmax.f32 %v313_v30, 0.0  ;;  %v939_v26 = vld [vmem:[%s1187_s23 + $0x78] sm:$0xff]  }
  0x2b   : > { %v360_v40 = vmax.f32 %v328_v31, 0.0  ;;  %v278_v41 = vmul.f32 %v879_v32, %v1203_v14  ;;  %v361_v43 = vmax.f32 %v329_v35, 0.0  ;;  %v279_v44 = vmul.f32 %v880_v33, %v1203_v14 }
  0x2c   : > { %509 = vmatpush1.bf16.msra.mxu0 %v1021_v47  ;;  %955 = vmatpush1.bf16.msra.mxu1 %v1021_v47  ;;  %v294_v45 = vmul.f32 %v911_v36, %v1203_v14  ;;  %v295_v46 = vmul.f32 %v912_v37, %v1203_v14  ;;  %v937_v47 = vld [vmem:[%s1187_s23 + $0x68] sm:$0xff]   ;;  %v883_v48 = vunpack.c.l.bf16 %v929_v42  ;;  %v884_v49 = vunpack.c.h.bf16 %v929_v42  ;;  %s189_s23 = sand.u32 1, %s1076_s16  }
  0x2d   : > { %v373_v50 = vpack.c.bf16 %v345_v39, %v344_v38  ;;  %v915_v52 = vunpack.c.l.bf16 %v937_v47  ;;  %v916_v53 = vunpack.c.h.bf16 %v937_v47  ;;  %v381_v54 = vpack.c.bf16 %v361_v43, %v360_v40  ;;  %s832_s11 = sshll.u32 %s189_s23, 9  ;;  %s1474_s27 = scalar_lea.sflag [#allocation3], %s189_s23 }
  0x2e   : > { %v330_v56 = vadd.f32 %v1217_v22, %v294_v45  ;;  %v331_v57 = vadd.f32 %v1217_v22, %v295_v46  ;;  %v280_v58 = vmul.f32 %v883_v48, %v1203_v14  ;;  %v281_v59 = vmul.f32 %v884_v49, %v1203_v14  ;;  %s1337_s12 = scalar_lea.vmem [#allocation2], %s832_s11 }
  0x2f   : > { %527 = vmatmul.mubr.bf16.vlgmr.msra.gmra.mrb[0].mxu0 %v370_v51  ;;  %607 = vmatmul.mubr.bf16.vlgmr.msra.gmra.mrb[0].mxu1 %v378_v55  ;;  %v314_v51 = vadd.f32 %v1217_v22, %v278_v41  ;;  %v315_v55 = vadd.f32 %v1217_v22, %v279_v44  ;;  %v296_v60 = vmul.f32 %v915_v52, %v1203_v14  ;;  %v887_v7 = vunpack.c.l.bf16 %v930_v62  ;;  %s766_s14 = sshll.u32 %s1337_s12, 4  ;;  %s1462_s14 = int_to_ptr.vmem [resolvable:$true] %s766_s14 }
  0x30   : > { %536 = vmatprep.mubr.bf16.mxu0 %v1086_v2  ;;  %616 = vmatprep.mubr.bf16.mxu1 %v1086_v2  ;;  %v297_v61 = vmul.f32 %v916_v53, %v1203_v14  ;;  %v362_v1 = vmax.f32 %v330_v56, 0.0  ;;  %v363_v3 = vmax.f32 %v331_v57, 0.0  ;;  %v316_v5 = vadd.f32 %v1217_v22, %v280_v58  ;;  %s1022_s28 = scalar_lea.vmem %s1462_s14, 8192  ;;  %p1029_p0 = scmp.lt.s32.totalorder %s1462_s14, %s1027_s30 }
  0x31   : > { %v346_v63 = vmax.f32 %v314_v51, 0.0  ;;  %v347_v0 = vmax.f32 %v315_v55, 0.0  ;;  %v317_v6 = vadd.f32 %v1217_v22, %v281_v59  ;;  %v332_v8 = vadd.f32 %v1217_v22, %v296_v60  ;;  %p1023_p11 = scmp.ne.s32.totalorder %s1462_s14, %s1022_s28  ;;  %p1030_p1 = scmp.lt.s32.totalorder %s1028_s5, %s1022_s28 }
  0x32   : > { %v888_v10 = vunpack.c.h.bf16 %v930_v62  ;;  %v919_v13 = vunpack.c.l.bf16 %v938_v4  ;;  %v920_v15 = vunpack.c.h.bf16 %v938_v4  ;;  %v348_v16 = vmax.f32 %v316_v5, 0.0 }
  0x33   : > { %v374_v11 = vpack.c.bf16 %v347_v0, %v346_v63  ;;  %v349_v17 = vmax.f32 %v317_v6, 0.0  ;;  %v282_v18 = vmul.f32 %v887_v7, %v1203_v14  ;;  %v364_v19 = vmax.f32 %v332_v8, 0.0  ;;  %p1024_p12 = pnand %p1023_p11, %p1153_p5  ;;  %p1031_p2 = por %p1030_p1, %p1029_p0 }
  0x34   : > { %v283_v21 = vmul.f32 %v888_v10, %v1203_v14  ;;  %v298_v23 = vmul.f32 %v919_v13, %v1203_v14  ;;  %v299_v24 = vmul.f32 %v920_v15, %v1203_v14  ;;  %v891_v31 = vunpack.c.l.bf16 %v931_v25 }
  0x35   : > { %v375_v27 = vpack.c.bf16 %v349_v17, %v348_v16  ;;  %v892_v32 = vunpack.c.h.bf16 %v931_v25  ;;  %v923_v35 = vunpack.c.l.bf16 %v939_v26  ;;  %v924_v36 = vunpack.c.h.bf16 %v939_v26  ;;  %p1025_p13 = pneg %p1024_p12 }
  0x36   : > { %v319_v30 = vadd.f32 %v1217_v22, %v283_v21  ;;  %v334_v33 = vadd.f32 %v1217_v22, %v298_v23  ;;  %v284_v39 = vmul.f32 %v891_v31, %v1203_v14  ;;  %v404_v56 = vlaneseq }
  0x37   : > { %537 = vmatmul.mubr.bf16.gmra.mrb[4].mxu0 %v371_v9  ;;  %617 = vmatmul.mubr.bf16.gmra.mrb[4].mxu1 %v379_v12  ;;  %v333_v9 = vadd.f32 %v1217_v22, %v297_v61  ;;  %v382_v12 = vpack.c.bf16 %v363_v3, %v362_v1  ;;  %v285_v40 = vmul.f32 %v892_v32, %v1203_v14  ;;  %p1032_p3 = pnand %p1031_p2, %p1025_p13 }
  0x38   : > { %546 = vmatprep.mubr.bf16.mxu0 %v1086_v2  ;;  %626 = vmatprep.mubr.bf16.mxu1 %v1086_v2  ;;  %v351_v38 = vmax.f32 %v319_v30, 0.0  ;;  %v366_v41 = vmax.f32 %v334_v33, 0.0  ;;  %v300_v43 = vmul.f32 %v923_v35, %v1203_v14  ;;  %v301_v44 = vmul.f32 %v924_v36, %v1203_v14 }
  0x39   : > { %v365_v20 = vmax.f32 %v333_v9, 0.0  ;;  %v320_v46 = vadd.f32 %v1217_v22, %v284_v39  ;;  %v321_v48 = vadd.f32 %v1217_v22, %v285_v40  ;;  %v405_v57 = vshrl.u32 %v404_v56, 7 }
  0x3a   : > { %v336_v49 = vadd.f32 %v1217_v22, %v300_v43 }
  0x3b   : > { %v383_v29 = vpack.c.bf16 %v365_v20, %v364_v19  ;;  %v352_v51 = vmax.f32 %v320_v46, 0.0  ;;  %v353_v14 = vmax.f32 %v321_v48, 0.0  ;;  %v406_v58 = vsub.s32 0, %v405_v57 }
  0x3c   : > { %v368_v52 = vmax.f32 %v336_v49, 0.0  ;;  %v410_v59 = vsub.s32 1, %v405_v57 }
  0x3f   : > { %547 = vmatmul.mubr.bf16.gmra.mrb[8].mxu0 %v372_v28  ;;  %627 = vmatmul.mubr.bf16.gmra.mrb[8].mxu1 %v380_v34  ;;  %v318_v28 = vadd.f32 %v1217_v22, %v282_v18  ;;  %v335_v34 = vadd.f32 %v1217_v22, %v299_v24 }
  0x40   : > { %556 = vmatprep.mubr.bf16.mxu0 %v1086_v2  ;;  %636 = vmatprep.mubr.bf16.mxu1 %v1086_v2 }
  0x41   : > { %v350_v37 = vmax.f32 %v318_v28, 0.0  ;;  %v367_v42 = vmax.f32 %v335_v34, 0.0 }
  0x43   : > { %v376_v45 = vpack.c.bf16 %v351_v38, %v350_v37  ;;  %v384_v47 = vpack.c.bf16 %v367_v42, %v366_v41 }
  0x47   : > { %557 = vmatmul.mubr.bf16.gmra.mrb[12].mxu0 %v373_v50  ;;  %637 = vmatmul.mubr.bf16.gmra.mrb[12].mxu1 %v381_v54  ;;  %v337_v50 = vadd.f32 %v1217_v22, %v301_v44  ;;  %v377_v54 = vpack.c.bf16 %v353_v14, %v352_v51  ;;  %v402_v22 = vld [vmem:[%s1518_s3] sm:$0x3] }
  0x48   : > { %566 = vmatprep.mubr.bf16.mxu0 %v1086_v2  ;;  %646 = vmatprep.mubr.bf16.mxu1 %v1086_v2  ;;  %v1329_v60 = vrot.slane %v402_v22, %v406_v58  ;;  %v1331_v61 = vrot.slane %v402_v22, %v410_v59 }
  0x49   : > { %v369_v53 = vmax.f32 %v337_v50, 0.0 }
  0x4b   : > { %v385_v55 = vpack.c.bf16 %v369_v53, %v368_v52 }
  0x4f   : > { %567 = vmatmul.mubr.bf16.gmra.mrb[16].mxu0 %v374_v11  ;;  %647 = vmatmul.mubr.bf16.gmra.mrb[16].mxu1 %v382_v12 }
  0x50   : > { %576 = vmatprep.mubr.bf16.mxu0 %v1086_v2  ;;  %656 = vmatprep.mubr.bf16.mxu1 %v1086_v2 }
  0x57   : > { %577 = vmatmul.mubr.bf16.gmra.mrb[20].mxu0 %v375_v27  ;;  %657 = vmatmul.mubr.bf16.gmra.mrb[20].mxu1 %v383_v29 }
  0x58   : > { %586 = vmatprep.mubr.bf16.mxu0 %v1086_v2  ;;  %666 = vmatprep.mubr.bf16.mxu1 %v1086_v2 }
  0x5f   : > { %587 = vmatmul.mubr.bf16.gmra.mrb[24].mxu0 %v376_v45  ;;  %667 = vmatmul.mubr.bf16.gmra.mrb[24].mxu1 %v384_v47 }
  0x60   : > { %596 = vmatprep.mubr.bf16.mxu0 %v1086_v2  ;;  %676 = vmatprep.mubr.bf16.mxu1 %v1086_v2 }
  0x67   : > { %597 = vmatmul.mubr.bf16.gmra.mrb[28].mxu0 %v377_v54  ;;  %677 = vmatmul.mubr.bf16.gmra.mrb[28].mxu1 %v385_v55 }
 0x102   : > { %v528_v2 = vpop.f32.mrb[0].mxu0  ;;  %v608_v62 = vpop.f32.mrb[0].mxu1 }
 0x103   : > { %v529_v63 = vadd.f32 %v528_v2, %v1329_v60  ;;  %v609_v0 = vadd.f32 %v608_v62, %v1329_v60  ;;  %v530_v1 = vpop.f32.mrb[1].mxu0  ;;  %v610_v3 = vpop.f32.mrb[1].mxu1 }
 0x104   : > { %v531_v4 = vadd.f32 %v530_v1, %v1331_v61  ;;  %v611_v5 = vadd.f32 %v610_v3, %v1331_v61  ;;  %v532_v6 = vpop.f32.mrb[2].mxu0  ;;  %v612_v7 = vpop.f32.mrb[2].mxu1 }
 0x105   : > { %687 = vst [vmem:[%s1337_s12] sm:$0xff] %v529_v63  ;;  %719 = vst [vmem:[%s1337_s12 + $0x100] sm:$0xff] %v609_v0  ;;  %v533_v8 = vadd.f32 %v532_v6, %v1329_v60  ;;  %v613_v9 = vadd.f32 %v612_v7, %v1329_v60  ;;  %v534_v10 = vpop.f32.mrb[3].mxu0  ;;  %v614_v11 = vpop.f32.mrb[3].mxu1 }
 0x106   : > { %688 = vst [vmem:[%s1337_s12 + $0x8] sm:$0xff] %v531_v4  ;;  %720 = vst [vmem:[%s1337_s12 + $0x108] sm:$0xff] %v611_v5  ;;  %v535_v12 = vadd.f32 %v534_v10, %v1331_v61  ;;  %v615_v13 = vadd.f32 %v614_v11, %v1331_v61 }
 0x107   : > { %689 = vst [vmem:[%s1337_s12 + $0x10] sm:$0xff] %v533_v8  ;;  %721 = vst [vmem:[%s1337_s12 + $0x110] sm:$0xff] %v613_v9 }
 0x108   : > { %690 = vst [vmem:[%s1337_s12 + $0x18] sm:$0xff] %v535_v12  ;;  %722 = vst [vmem:[%s1337_s12 + $0x118] sm:$0xff] %v615_v13 }
 0x10a   : > { %v538_v15 = vpop.f32.mrb[4].mxu0  ;;  %v618_v16 = vpop.f32.mrb[4].mxu1 }
 0x10b   : > { %v539_v17 = vadd.f32 %v538_v15, %v1329_v60  ;;  %v619_v18 = vadd.f32 %v618_v16, %v1329_v60  ;;  %v540_v19 = vpop.f32.mrb[5].mxu0  ;;  %v620_v20 = vpop.f32.mrb[5].mxu1 }
 0x10c   : > { %v541_v21 = vadd.f32 %v540_v19, %v1331_v61  ;;  %v621_v23 = vadd.f32 %v620_v20, %v1331_v61  ;;  %v542_v24 = vpop.f32.mrb[6].mxu0  ;;  %v622_v25 = vpop.f32.mrb[6].mxu1 }
 0x10d   : > { %691 = vst [vmem:[%s1337_s12 + $0x20] sm:$0xff] %v539_v17  ;;  %723 = vst [vmem:[%s1337_s12 + $0x120] sm:$0xff] %v619_v18  ;;  %v543_v26 = vadd.f32 %v542_v24, %v1329_v60  ;;  %v623_v27 = vadd.f32 %v622_v25, %v1329_v60  ;;  %v544_v28 = vpop.f32.mrb[7].mxu0  ;;  %v624_v29 = vpop.f32.mrb[7].mxu1 }
 0x10e   : > { %692 = vst [vmem:[%s1337_s12 + $0x28] sm:$0xff] %v541_v21  ;;  %724 = vst [vmem:[%s1337_s12 + $0x128] sm:$0xff] %v621_v23  ;;  %v545_v30 = vadd.f32 %v544_v28, %v1331_v61  ;;  %v625_v31 = vadd.f32 %v624_v29, %v1331_v61 }
 0x10f   : > { %693 = vst [vmem:[%s1337_s12 + $0x30] sm:$0xff] %v543_v26  ;;  %725 = vst [vmem:[%s1337_s12 + $0x130] sm:$0xff] %v623_v27 }
 0x110   : > { %694 = vst [vmem:[%s1337_s12 + $0x38] sm:$0xff] %v545_v30  ;;  %726 = vst [vmem:[%s1337_s12 + $0x138] sm:$0xff] %v625_v31 }
 0x112   : > { %v548_v32 = vpop.f32.mrb[8].mxu0  ;;  %v628_v33 = vpop.f32.mrb[8].mxu1 }
 0x113   : > { %v549_v34 = vadd.f32 %v548_v32, %v1329_v60  ;;  %v629_v35 = vadd.f32 %v628_v33, %v1329_v60  ;;  %v550_v36 = vpop.f32.mrb[9].mxu0  ;;  %v630_v37 = vpop.f32.mrb[9].mxu1 }
 0x114   : > { %v551_v38 = vadd.f32 %v550_v36, %v1331_v61  ;;  %v631_v39 = vadd.f32 %v630_v37, %v1331_v61  ;;  %v552_v40 = vpop.f32.mrb[10].mxu0  ;;  %v632_v41 = vpop.f32.mrb[10].mxu1 }
 0x115   : > { %695 = vst [vmem:[%s1337_s12 + $0x40] sm:$0xff] %v549_v34  ;;  %727 = vst [vmem:[%s1337_s12 + $0x140] sm:$0xff] %v629_v35  ;;  %v553_v42 = vadd.f32 %v552_v40, %v1329_v60  ;;  %v633_v43 = vadd.f32 %v632_v41, %v1329_v60  ;;  %v554_v44 = vpop.f32.mrb[11].mxu0  ;;  %v634_v45 = vpop.f32.mrb[11].mxu1 }
 0x116   : > { %696 = vst [vmem:[%s1337_s12 + $0x48] sm:$0xff] %v551_v38  ;;  %728 = vst [vmem:[%s1337_s12 + $0x148] sm:$0xff] %v631_v39  ;;  %v555_v46 = vadd.f32 %v554_v44, %v1331_v61  ;;  %v635_v47 = vadd.f32 %v634_v45, %v1331_v61 }
 0x117   : > { %697 = vst [vmem:[%s1337_s12 + $0x50] sm:$0xff] %v553_v42  ;;  %729 = vst [vmem:[%s1337_s12 + $0x150] sm:$0xff] %v633_v43 }
 0x118   : > { %698 = vst [vmem:[%s1337_s12 + $0x58] sm:$0xff] %v555_v46  ;;  %730 = vst [vmem:[%s1337_s12 + $0x158] sm:$0xff] %v635_v47 }
 0x11a   : > { %v558_v48 = vpop.f32.mrb[12].mxu0  ;;  %v638_v49 = vpop.f32.mrb[12].mxu1 }
 0x11b   : > { %v559_v50 = vadd.f32 %v558_v48, %v1329_v60  ;;  %v639_v51 = vadd.f32 %v638_v49, %v1329_v60  ;;  %v560_v14 = vpop.f32.mrb[13].mxu0  ;;  %v640_v52 = vpop.f32.mrb[13].mxu1 }
 0x11c   : > { %v561_v53 = vadd.f32 %v560_v14, %v1331_v61  ;;  %v641_v54 = vadd.f32 %v640_v52, %v1331_v61  ;;  %v562_v55 = vpop.f32.mrb[14].mxu0  ;;  %v642_v56 = vpop.f32.mrb[14].mxu1 }
 0x11d   : > { %699 = vst [vmem:[%s1337_s12 + $0x60] sm:$0xff] %v559_v50  ;;  %731 = vst [vmem:[%s1337_s12 + $0x160] sm:$0xff] %v639_v51  ;;  %v563_v57 = vadd.f32 %v562_v55, %v1329_v60  ;;  %v643_v58 = vadd.f32 %v642_v56, %v1329_v60  ;;  %v564_v22 = vpop.f32.mrb[15].mxu0  ;;  %v644_v59 = vpop.f32.mrb[15].mxu1 }
 0x11e   : > { %700 = vst [vmem:[%s1337_s12 + $0x68] sm:$0xff] %v561_v53  ;;  %732 = vst [vmem:[%s1337_s12 + $0x168] sm:$0xff] %v641_v54  ;;  %v565_v2 = vadd.f32 %v564_v22, %v1331_v61  ;;  %v645_v62 = vadd.f32 %v644_v59, %v1331_v61 }
 0x11f   : > { %701 = vst [vmem:[%s1337_s12 + $0x70] sm:$0xff] %v563_v57  ;;  %733 = vst [vmem:[%s1337_s12 + $0x170] sm:$0xff] %v643_v58 }
 0x120   : > { %702 = vst [vmem:[%s1337_s12 + $0x78] sm:$0xff] %v565_v2  ;;  %734 = vst [vmem:[%s1337_s12 + $0x178] sm:$0xff] %v645_v62 }
 0x122   : > { %v568_v63 = vpop.f32.mrb[16].mxu0  ;;  %v648_v0 = vpop.f32.mrb[16].mxu1 }
 0x123   : > { %v569_v1 = vadd.f32 %v568_v63, %v1329_v60  ;;  %v649_v3 = vadd.f32 %v648_v0, %v1329_v60  ;;  %v570_v4 = vpop.f32.mrb[17].mxu0  ;;  %v650_v5 = vpop.f32.mrb[17].mxu1 }
 0x124   : > { %v571_v6 = vadd.f32 %v570_v4, %v1331_v61  ;;  %v651_v7 = vadd.f32 %v650_v5, %v1331_v61  ;;  %v572_v8 = vpop.f32.mrb[18].mxu0  ;;  %v652_v9 = vpop.f32.mrb[18].mxu1 }
 0x125   : > { %703 = vst [vmem:[%s1337_s12 + $0x80] sm:$0xff] %v569_v1  ;;  %735 = vst [vmem:[%s1337_s12 + $0x180] sm:$0xff] %v649_v3  ;;  %v573_v10 = vadd.f32 %v572_v8, %v1329_v60  ;;  %v653_v11 = vadd.f32 %v652_v9, %v1329_v60  ;;  %v574_v12 = vpop.f32.mrb[19].mxu0  ;;  %v654_v13 = vpop.f32.mrb[19].mxu1 }
 0x126   : > { %704 = vst [vmem:[%s1337_s12 + $0x88] sm:$0xff] %v571_v6  ;;  %736 = vst [vmem:[%s1337_s12 + $0x188] sm:$0xff] %v651_v7  ;;  %v575_v15 = vadd.f32 %v574_v12, %v1331_v61  ;;  %v655_v16 = vadd.f32 %v654_v13, %v1331_v61 }
 0x127   : > { %705 = vst [vmem:[%s1337_s12 + $0x90] sm:$0xff] %v573_v10  ;;  %737 = vst [vmem:[%s1337_s12 + $0x190] sm:$0xff] %v653_v11 }
 0x128   : > { %706 = vst [vmem:[%s1337_s12 + $0x98] sm:$0xff] %v575_v15  ;;  %738 = vst [vmem:[%s1337_s12 + $0x198] sm:$0xff] %v655_v16 }
 0x12a   : > { %v578_v17 = vpop.f32.mrb[20].mxu0  ;;  %v658_v18 = vpop.f32.mrb[20].mxu1 }
 0x12b   : > { %v579_v19 = vadd.f32 %v578_v17, %v1329_v60  ;;  %v659_v20 = vadd.f32 %v658_v18, %v1329_v60  ;;  %v580_v21 = vpop.f32.mrb[21].mxu0  ;;  %v660_v23 = vpop.f32.mrb[21].mxu1 }
 0x12c   : > { %v581_v24 = vadd.f32 %v580_v21, %v1331_v61  ;;  %v661_v25 = vadd.f32 %v660_v23, %v1331_v61  ;;  %v582_v26 = vpop.f32.mrb[22].mxu0  ;;  %v662_v27 = vpop.f32.mrb[22].mxu1 }
 0x12d   : > { %707 = vst [vmem:[%s1337_s12 + $0xa0] sm:$0xff] %v579_v19  ;;  %739 = vst [vmem:[%s1337_s12 + $0x1a0] sm:$0xff] %v659_v20  ;;  %v583_v28 = vadd.f32 %v582_v26, %v1329_v60  ;;  %v663_v29 = vadd.f32 %v662_v27, %v1329_v60  ;;  %v584_v30 = vpop.f32.mrb[23].mxu0  ;;  %v664_v31 = vpop.f32.mrb[23].mxu1 }
 0x12e   : > { %708 = vst [vmem:[%s1337_s12 + $0xa8] sm:$0xff] %v581_v24  ;;  %740 = vst [vmem:[%s1337_s12 + $0x1a8] sm:$0xff] %v661_v25  ;;  %v585_v32 = vadd.f32 %v584_v30, %v1331_v61  ;;  %v665_v33 = vadd.f32 %v664_v31, %v1331_v61 }
 0x12f   : > { %709 = vst [vmem:[%s1337_s12 + $0xb0] sm:$0xff] %v583_v28  ;;  %741 = vst [vmem:[%s1337_s12 + $0x1b0] sm:$0xff] %v663_v29 }
 0x130   : > { %710 = vst [vmem:[%s1337_s12 + $0xb8] sm:$0xff] %v585_v32  ;;  %742 = vst [vmem:[%s1337_s12 + $0x1b8] sm:$0xff] %v665_v33 }
 0x132   : > { %v588_v34 = vpop.f32.mrb[24].mxu0  ;;  %v668_v35 = vpop.f32.mrb[24].mxu1 }
 0x133   : > { %v589_v36 = vadd.f32 %v588_v34, %v1329_v60  ;;  %v669_v37 = vadd.f32 %v668_v35, %v1329_v60  ;;  %v590_v38 = vpop.f32.mrb[25].mxu0  ;;  %v670_v39 = vpop.f32.mrb[25].mxu1 }
 0x134   : > { %v591_v40 = vadd.f32 %v590_v38, %v1331_v61  ;;  %v671_v41 = vadd.f32 %v670_v39, %v1331_v61  ;;  %v592_v42 = vpop.f32.mrb[26].mxu0  ;;  %v672_v43 = vpop.f32.mrb[26].mxu1 }
 0x135   : > { %711 = vst [vmem:[%s1337_s12 + $0xc0] sm:$0xff] %v589_v36  ;;  %743 = vst [vmem:[%s1337_s12 + $0x1c0] sm:$0xff] %v669_v37  ;;  %v593_v44 = vadd.f32 %v592_v42, %v1329_v60  ;;  %v673_v45 = vadd.f32 %v672_v43, %v1329_v60  ;;  %v594_v46 = vpop.f32.mrb[27].mxu0  ;;  %v674_v47 = vpop.f32.mrb[27].mxu1 }
 0x136   : > { %712 = vst [vmem:[%s1337_s12 + $0xc8] sm:$0xff] %v591_v40  ;;  %744 = vst [vmem:[%s1337_s12 + $0x1c8] sm:$0xff] %v671_v41  ;;  %v595_v48 = vadd.f32 %v594_v46, %v1331_v61  ;;  %v675_v49 = vadd.f32 %v674_v47, %v1331_v61 }
 0x137   : > { %713 = vst [vmem:[%s1337_s12 + $0xd0] sm:$0xff] %v593_v44  ;;  %745 = vst [vmem:[%s1337_s12 + $0x1d0] sm:$0xff] %v673_v45 }
 0x138   : > { %714 = vst [vmem:[%s1337_s12 + $0xd8] sm:$0xff] %v595_v48  ;;  %746 = vst [vmem:[%s1337_s12 + $0x1d8] sm:$0xff] %v675_v49 }
 0x13a   : > { %v598_v50 = vpop.f32.mrb[28].mxu0  ;;  %v678_v51 = vpop.f32.mrb[28].mxu1 }
 0x13b   : > { %v599_v14 = vadd.f32 %v598_v50, %v1329_v60  ;;  %v679_v52 = vadd.f32 %v678_v51, %v1329_v60  ;;  %v600_v53 = vpop.f32.mrb[29].mxu0  ;;  %v680_v54 = vpop.f32.mrb[29].mxu1 }
 0x13c   : > { %v601_v55 = vadd.f32 %v600_v53, %v1331_v61  ;;  %v681_v56 = vadd.f32 %v680_v54, %v1331_v61  ;;  %v602_v57 = vpop.f32.mrb[30].mxu0  ;;  %v682_v58 = vpop.f32.mrb[30].mxu1 }
 0x13d   : > { %715 = vst [vmem:[%s1337_s12 + $0xe0] sm:$0xff] %v599_v14  ;;  %747 = vst [vmem:[%s1337_s12 + $0x1e0] sm:$0xff] %v679_v52  ;;  %v603_v22 = vadd.f32 %v602_v57, %v1329_v60  ;;  %v683_v59 = vadd.f32 %v682_v58, %v1329_v60  ;;  %v604_v2 = vpop.f32.mrb[31].mxu0  ;;  %v684_v62 = vpop.f32.mrb[31].mxu1 }
 0x13e   : > { %716 = vst [vmem:[%s1337_s12 + $0xe8] sm:$0xff] %v601_v55  ;;  %748 = vst [vmem:[%s1337_s12 + $0x1e8] sm:$0xff] %v681_v56  ;;  %v605_v63 = vadd.f32 %v604_v2, %v1331_v61  ;;  %v685_v0 = vadd.f32 %v684_v62, %v1331_v61 }
 0x13f   : > { %717 = vst [vmem:[%s1337_s12 + $0xf0] sm:$0xff] %v603_v22  ;;  %749 = vst [vmem:[%s1337_s12 + $0x1f0] sm:$0xff] %v683_v59 }
 0x140   : > { %718 = vst [vmem:[%s1337_s12 + $0xf8] sm:$0xff] %v605_v63  ;;  %750 = vst [vmem:[%s1337_s12 + $0x1f8] sm:$0xff] %v685_v0 }
 0x141   : > { %1035 = shalt.err (!%p1032_p3)
}
 0x142   : > { %s1036_s6 = scalar_lea.hbm %s1460_s22, 8192  ;;  %s1040_s23 = scalar_lea.hbm %s1519_s4, 16384 }
 0x143   : > { %p1037_p4 = scmp.ne.s32.totalorder %s1460_s22, %s1036_s6  ;;  %p1041_p9 = scmp.lt.u32.totalorder %s1460_s22, %s1519_s4 }
 0x144   : > { %p1042_p10 = scmp.lt.u32.totalorder %s1040_s23, %s1036_s6  ;;  %p1044_p12 = scmp.lt.u32.totalorder %s1036_s6, %s1460_s22 }
 0x145   : > { %p1038_p7 = pnand %p1037_p4, %p1153_p5 }
 0x146   : > { %p1043_p11 = por %p1042_p10, %p1041_p9 }
 0x147   : > { %p1039_p8 = pneg %p1038_p7 }
 0x148   : > { %p1045_p13 = por %p1044_p12, %p1043_p11 }
 0x14a   : > { %p1046_p0 = pnand %p1045_p13, %p1039_p8 }
 0x14c   : > { %1049 = shalt.err (!%p1046_p0)
}
 0x14d   : > { %s1088_s11 = smov 256   ;;  %s1089_s12 = smov 16  }
 0x14e   : > { %956 = dma.vmem_to_hbm [thread:$0]  (%p1153_p5), %s1462_s14, 8192, %s1460_s22, %s1474_s27, %s1088_s11, %s1088_s11, %s1089_s12  }
 0x14f PF: > { %p962_p1 = scmp.ge.s32.totalorder %s1084_s18, 2  ;;  %s781_s13 = sand.u32 1, %s1072_s15  }
 0x150   : > { %s782_s19 = scalar_lea.sflag [#allocation3], %s781_s13 }
 0x151   : > { %p959_p2 = pnand %p962_p1, %p1157_p6 }
 0x153   : > { %1067 = dma.done.wait (!%p959_p2), %s782_s19, 8192  }
 0x154   : > { %1069 = vsyncadd (!%p959_p2), %s782_s19, 4294959104  ;;  %p14_p3 = scmp.ge.s32.totalorder %s1140_s21, 4   ;;  %s1522_s15 = smov %s1076_s16 }
 0x155   : > { %s1523_s16 = smov %s1080_s17  ;;  %s1524_s17 = smov %s1151_s24 }
 0x156   : > { %s1525_s18 = smov %s1140_s21  ;;  %16 = sbr.rel (!%p14_p3) target bundleno = 3 (0x3), region = 71 }
 0x15d   :  { %787 = vsyncpa [#allocation3], 1 }
 0x15e   :  { %789 = vsyncpa [#allocation3 + $0x1], 1 }

// kernel: predictor_forward.2
= control target key start
LH: loop header
LB: loop body
LE: loop exit
PB: predicated region body
PF: predicated region fallthrough
CT: control target
= control target key end

     0   :  { %9 = vsyncpa [#allocation3], 0  ;;  %s1751_s0 = inlined_call_operand.hbm [shape: f32[512,256], index: 0, kind: input, shape index: {}]   ;;  %s1752_s1 = inlined_call_operand.vmem [shape: bf16[256,128], index: 1, kind: input, shape index: {}]   ;;  %s1753_s2 = inlined_call_operand.vmem [shape: bf16[512,128], index: 2, kind: output, shape index: {0}]   ;;  %s1754_s3 = inlined_call_operand.vmem [shape: f32[2,2,128], index: 3, kind: output, shape index: {1}]  }
   0x1   :  { %11 = vsyncpa [#allocation3 + $0x1], 0  ;;  %s1423_s12 = smov 0   ;;  %s1425_s13 = smov 0  }
   0x2   :  { %s1427_s14 = smov 0   ;;  %s1429_s15 = smov 0  }
   0x3 LB: > { %s1442_s16 = sadd.s32 4294967295, %s1398_s15   ;;  %s1445_s17 = sadd.s32 1, %s1398_s15   ;;  %s1398_s15 = sphi %s1429_s15, %s1761_s15   ;;  %s1394_s14 = sphi %s1427_s14, %s1760_s14   ;;  %s1390_s13 = sphi %s1425_s13, %s1759_s13   ;;  %s1386_s12 = sphi %s1423_s12, %s1758_s12  }
   0x4   : > { %s21_s18 = ssub.s32 %s1398_s15, %s1445_s17  ;;  %s24_s19 = sadd.s32 1, %s1394_s14 }
   0x5   : > { %p22_p0 = scmp.eq.s32.totalorder %s21_s18, 0  ;;  %p31_p1 = scmp.ne.s32.totalorder %s1394_s14, %s1390_s13 }
   0x6   : > { %p32_p2 = scmp.eq.s32.totalorder %s1398_s15, 0  ;;  %p37_p3 = scmp.ne.s32.totalorder %s1390_s13, %s1386_s12 }
   0x7   : > { %s1455_s20 = scalar_select %p22_p0, %s1394_s14, %s24_s19  }
   0x8   : > { %p33_p4 = por %p32_p2, %p31_p1  ;;  %p38_p5 = scmp.eq.s32.totalorder %s1442_s16, 0 }
   0x9   : > { %p1283_p6 = scmp.lt.s32.totalorder %s1398_s15, 2  ;;  %s137_s22 = sand.u32 1, %s1394_s14  }
   0xa   : > { %p1459_p7 = por %p38_p5, %p37_p3  ;;  %s961_s23 = sshll.u32 %s137_s22, 9 }
   0xb   : > { %s1021_s24 = sshll.u32 %s1398_s15, 13  ;;  %s141_s28 = scalar_lea.vmem [#allocation2], %s961_s23 }
   0xc   : > { %s1468_s27 = scalar_lea.hbm %s1751_s0, %s1021_s24  ;;  %s149_s29 = sshll.u32 %s141_s28, 4  ;;  %s1470_s29 = int_to_ptr.vmem [resolvable:$true] %s149_s29 }
   0xd   : > { %p1472_p8 = pnand %p1283_p6, %p33_p4  ;;  %s1477_s4 = scalar_lea.sflag [#allocation3], %s137_s22 }
   0xe   : > { %s1334_s5 = scalar_lea.hbm %s1468_s27, 8192  ;;  %s1339_s8 = scalar_lea.hbm %s1751_s0, 16384 }
   0xf   : > { %p1335_p10 = scmp.ne.s32.totalorder %s1468_s27, %s1334_s5  ;;  %p1336_p11 = pneg %p1472_p8 }
  0x10   : > { %p1340_p0 = scmp.lt.u32.totalorder %s1468_s27, %s1751_s0  ;;  %p1341_p1 = scmp.lt.u32.totalorder %s1339_s8, %s1334_s5 }
  0x11   : > { %p1337_p12 = pnand %p1336_p11, %p1335_p10  ;;  %p1343_p3 = scmp.lt.u32.totalorder %s1334_s5, %s1468_s27 }
  0x12   : > { %p1342_p2 = por %p1341_p1, %p1340_p0 }
  0x13   : > { %p1338_p13 = pneg %p1337_p12 }
  0x14   : > { %p1344_p4 = por %p1343_p3, %p1342_p2 }
  0x16   : > { %p1345_p5 = pnand %p1344_p4, %p1338_p13 }
  0x18   : > { %1348 = shalt.err (!%p1345_p5)
}
  0x19   : > { %s1349_s11 = scalar_lea.vmem %s1470_s29, 8192  ;;  %s1400_s12 = smov [#allocation2]  }
  0x1a   : > { %p1350_p6 = scmp.ne.s32.totalorder %s1470_s29, %s1349_s11  ;;  %s1354_s18 = sshll.u32 %s1400_s12, 4  ;;  %s1355_s18 = int_to_ptr.vmem [resolvable:$false] %s1354_s18 }
  0x1b   : > { %s1356_s19 = scalar_lea.vmem %s1355_s18, 16384  ;;  %p1357_p9 = scmp.lt.s32.totalorder %s1470_s29, %s1355_s18 }
  0x1c   : > { %p1352_p10 = pnand %p1350_p6, %p1336_p11  ;;  %p1358_p0 = scmp.lt.s32.totalorder %s1356_s19, %s1349_s11 }
  0x1e   : > { %p1353_p12 = pneg %p1352_p10  ;;  %p1359_p1 = por %p1358_p0, %p1357_p9 }
  0x20   : > { %p1360_p2 = pnand %p1359_p1, %p1353_p12 }
  0x22   : > { %1363 = shalt.err (!%p1360_p2)
}
  0x23   : > { %s1401_s22 = smov 256   ;;  %s1402_s23 = smov 16  }
  0x24   : > { %1282 = dma.hbm_to_vmem [thread:$0]  (!%p1472_p8), %s1468_s27, 8192, %s1470_s29, %s1477_s4, %s1401_s22, %s1401_s22, %s1402_s23  }
  0x25   : > { %p157_p11 = scmp.lt.s32.totalorder %s1398_s15, 3  ;;  %p1757_p13 = scmp.ge.s32.totalorder %s1398_s15, 1 }
  0x27   : > { %p158_p3 = pnand %p1757_p13, %p157_p11 }
  0x28   : > { %s163_s24 = sand.u32 (!%p158_p3), 1, %s1390_s13  }
  0x29   : > { %161 = sbr.rel (%p158_p3) target bundleno = 404 (0x194), region = 28  ;;  %s966_s25 = sshll.u32 (!%p158_p3), %s163_s24, 9 }
  0x2a   : > { %s164_s26 = scalar_lea.sflag (!%p158_p3), [#allocation3], %s163_s24  ;;  %s1509_s28 = scalar_lea.vmem (!%p158_p3), [#allocation2], %s966_s25 }
  0x30   : > { %1381 = dma.done.wait (%p1459_p7), %s164_s26, 8192  }
  0x31   : > { %1383 = vsyncadd (%p1459_p7), %s164_s26, 4294959104  ;;  %v1318_v0 = vld [vmem:[%s1752_s1 + $0x40] sm:$0xff]   ;;  %v1320_v2 = vld [vmem:[%s1752_s1 + $0x48] sm:$0xff]   ;;  %s967_s10 = sshll.u32 %s1442_s16, 5  ;;  %p201_p8 = scmp.lt.s32.totalorder %s1442_s16, 1 }
  0x32   : > { %v1319_v1 = vld [vmem:[%s1752_s1] sm:$0xff]   ;;  %1149 = vmatprep.subr.bf16.mxu0 %v1318_v0  ;;  %1261 = vmatprep.subr.bf16.mxu1 %v1318_v0  ;;  %v1321_v3 = vld [vmem:[%s1752_s1 + $0x8] sm:$0xff]   ;;  %v1322_v4 = vld [vmem:[%s1752_s1 + $0x50] sm:$0xff]   ;;  %p196_p7 = scmp.lt.s32.totalorder %s967_s10, 63 }
  0x33   : > { %1150 = vmatpush3.bf16.msra.mxu0 %v1319_v1  ;;  %1269 = vmatpush3.bf16.msra.mxu1 %v1319_v1  ;;  %v1323_v5 = vld [vmem:[%s1752_s1 + $0x10] sm:$0xff]   ;;  %v1324_v6 = vld [vmem:[%s1752_s1 + $0x58] sm:$0xff]   ;;  %v1326_v8 = vld [vmem:[%s1752_s1 + $0x60] sm:$0xff]   ;;  %s1765_s16 = smov (!%p201_p8, %s1442_s16), 1 }
  0x34   : > { %1151 = vmatprep.subr.bf16.mxu0 %v1320_v2  ;;  %1262 = vmatprep.subr.bf16.mxu1 %v1320_v2  ;;  %v1325_v7 = vld [vmem:[%s1752_s1 + $0x18] sm:$0xff]   ;;  %v1327_v9 = vld [vmem:[%s1752_s1 + $0x20] sm:$0xff]   ;;  %v1328_v10 = vld [vmem:[%s1752_s1 + $0x68] sm:$0xff]   ;;  %s1763_s10 = smov (!%p196_p7, %s967_s10), 63  ;;  %s969_s19 = sshll.u32 %s1765_s16, 1 }
  0x35   : > { %v207_v11 = vld [vmem:[%s1509_s28 + $0x8] sm:$0xff]  ;;  %v209_v12 = vld [vmem:[%s1509_s28 + $0x18] sm:$0xff]  ;;  %v1330_v15 = vld [vmem:[%s1752_s1 + $0x70] sm:$0xff]   ;;  %s968_s11 = sshll.u32 %s1763_s10, 2  ;;  %s204_s24 = scalar_lea.vmem %s1754_s3, %s969_s19 }
  0x36   : > { %v271_v13 = vpack.c.bf16 %v209_v12, %v207_v11  ;;  %v1329_v14 = vld [vmem:[%s1752_s1 + $0x28] sm:$0xff]   ;;  %v241_v17 = vld [vmem:[%s1509_s28 + $0x118] sm:$0xff]  ;;  %v1331_v19 = vld [vmem:[%s1752_s1 + $0x30] sm:$0xff]   ;;  %s1633_s18 = scalar_lea.vmem %s1753_s2, %s968_s11 }
  0x37   : > { %1152 = vmatpush3.bf16.msra.mxu0 %v1321_v3  ;;  %1270 = vmatpush3.bf16.msra.mxu1 %v1321_v3  ;;  %v239_v16 = vld [vmem:[%s1509_s28 + $0x108] sm:$0xff]  ;;  %v1332_v20 = vld [vmem:[%s1752_s1 + $0x78] sm:$0xff]   ;;  %v206_v22 = vld [vmem:[%s1509_s28] sm:$0xff] }
  0x38   : > { %1153 = vmatprep.subr.bf16.mxu0 %v1322_v4  ;;  %1263 = vmatprep.subr.bf16.mxu1 %v1322_v4  ;;  %v287_v18 = vpack.c.bf16 %v241_v17, %v239_v16  ;;  %v1333_v21 = vld [vmem:[%s1752_s1 + $0x38] sm:$0xff]   ;;  %v208_v23 = vld [vmem:[%s1509_s28 + $0x10] sm:$0xff]  ;;  %v211_v24 = vld [vmem:[%s1509_s28 + $0x28] sm:$0xff] }
  0x39   : > { %462 = vmatprep.mubr.bf16.mxu0 %v271_v13  ;;  %v213_v25 = vld [vmem:[%s1509_s28 + $0x38] sm:$0xff]  ;;  %v238_v26 = vld [vmem:[%s1509_s28 + $0x100] sm:$0xff]  ;;  %v240_v27 = vld [vmem:[%s1509_s28 + $0x110] sm:$0xff]  ;;  %v270_v30 = vpack.c.bf16 %v208_v23, %v206_v22 }
  0x3a   : > { %526 = vmatprep.mubr.bf16.mxu1 %v287_v18  ;;  %v243_v28 = vld [vmem:[%s1509_s28 + $0x128] sm:$0xff]  ;;  %v245_v29 = vld [vmem:[%s1509_s28 + $0x138] sm:$0xff]  ;;  %v273_v31 = vpack.c.bf16 %v213_v25, %v211_v24  ;;  %v286_v32 = vpack.c.bf16 %v240_v27, %v238_v26  ;;  %v210_v34 = vld [vmem:[%s1509_s28 + $0x20] sm:$0xff] }
  0x3b   : > { %1154 = vmatpush3.bf16.msra.mxu0 %v1323_v5  ;;  %1271 = vmatpush3.bf16.msra.mxu1 %v1323_v5  ;;  %v289_v33 = vpack.c.bf16 %v245_v29, %v243_v28  ;;  %v212_v35 = vld [vmem:[%s1509_s28 + $0x30] sm:$0xff]  ;;  %v215_v36 = vld [vmem:[%s1509_s28 + $0x48] sm:$0xff]  ;;  %v217_v37 = vld [vmem:[%s1509_s28 + $0x58] sm:$0xff] }
  0x3c   : > { %1155 = vmatprep.subr.bf16.mxu0 %v1324_v6  ;;  %1264 = vmatprep.subr.bf16.mxu1 %v1324_v6  ;;  %v242_v38 = vld [vmem:[%s1509_s28 + $0x120] sm:$0xff]  ;;  %v244_v39 = vld [vmem:[%s1509_s28 + $0x130] sm:$0xff]  ;;  %v247_v40 = vld [vmem:[%s1509_s28 + $0x148] sm:$0xff]  ;;  %v272_v42 = vpack.c.bf16 %v212_v35, %v210_v34  ;;  %v275_v43 = vpack.c.bf16 %v217_v37, %v215_v36 }
  0x3d   : > { %v249_v41 = vld [vmem:[%s1509_s28 + $0x158] sm:$0xff]  ;;  %v288_v44 = vpack.c.bf16 %v244_v39, %v242_v38  ;;  %v214_v46 = vld [vmem:[%s1509_s28 + $0x40] sm:$0xff]  ;;  %v216_v47 = vld [vmem:[%s1509_s28 + $0x50] sm:$0xff] }
  0x3e   : > { %v291_v45 = vpack.c.bf16 %v249_v41, %v247_v40  ;;  %v219_v48 = vld [vmem:[%s1509_s28 + $0x68] sm:$0xff]  ;;  %v221_v49 = vld [vmem:[%s1509_s28 + $0x78] sm:$0xff]  ;;  %v246_v50 = vld [vmem:[%s1509_s28 + $0x140] sm:$0xff]  ;;  %v274_v54 = vpack.c.bf16 %v216_v47, %v214_v46 }
  0x3f   : > { %1156 = vmatpush3.bf16.msra.mxu0 %v1325_v7  ;;  %1272 = vmatpush3.bf16.msra.mxu1 %v1325_v7  ;;  %v248_v51 = vld [vmem:[%s1509_s28 + $0x150] sm:$0xff]  ;;  %v251_v52 = vld [vmem:[%s1509_s28 + $0x168] sm:$0xff]  ;;  %v253_v53 = vld [vmem:[%s1509_s28 + $0x178] sm:$0xff]  ;;  %v277_v55 = vpack.c.bf16 %v221_v49, %v219_v48 }
  0x40   : > { %1157 = vmatprep.subr.bf16.mxu0 %v1326_v8  ;;  %1265 = vmatprep.subr.bf16.mxu1 %v1326_v8  ;;  %v290_v56 = vpack.c.bf16 %v248_v51, %v246_v50  ;;  %v293_v57 = vpack.c.bf16 %v253_v53, %v251_v52  ;;  %v218_v58 = vld [vmem:[%s1509_s28 + $0x60] sm:$0xff]  ;;  %v220_v59 = vld [vmem:[%s1509_s28 + $0x70] sm:$0xff]  ;;  %v223_v60 = vld [vmem:[%s1509_s28 + $0x88] sm:$0xff] }
  0x41   : > { %v225_v61 = vld [vmem:[%s1509_s28 + $0x98] sm:$0xff]  ;;  %v250_v62 = vld [vmem:[%s1509_s28 + $0x160] sm:$0xff]  ;;  %v252_v63 = vld [vmem:[%s1509_s28 + $0x170] sm:$0xff]  ;;  %v276_v2 = vpack.c.bf16 %v220_v59, %v218_v58 }
  0x42   : > { %v255_v0 = vld [vmem:[%s1509_s28 + $0x188] sm:$0xff]  ;;  %v257_v1 = vld [vmem:[%s1509_s28 + $0x198] sm:$0xff]  ;;  %v279_v3 = vpack.c.bf16 %v225_v61, %v223_v60  ;;  %v292_v4 = vpack.c.bf16 %v252_v63, %v250_v62  ;;  %v222_v6 = vld [vmem:[%s1509_s28 + $0x80] sm:$0xff] }
  0x43   : > { %1158 = vmatpush3.bf16.msra.mxu0 %v1327_v9  ;;  %1273 = vmatpush3.bf16.msra.mxu1 %v1327_v9  ;;  %v295_v5 = vpack.c.bf16 %v257_v1, %v255_v0  ;;  %v224_v7 = vld [vmem:[%s1509_s28 + $0x90] sm:$0xff]  ;;  %v227_v8 = vld [vmem:[%s1509_s28 + $0xa8] sm:$0xff]  ;;  %v229_v9 = vld [vmem:[%s1509_s28 + $0xb8] sm:$0xff] }
  0x44   : > { %1159 = vmatprep.subr.bf16.mxu0 %v1328_v10  ;;  %1266 = vmatprep.subr.bf16.mxu1 %v1328_v10  ;;  %v254_v10 = vld [vmem:[%s1509_s28 + $0x180] sm:$0xff]  ;;  %v256_v11 = vld [vmem:[%s1509_s28 + $0x190] sm:$0xff]  ;;  %v259_v12 = vld [vmem:[%s1509_s28 + $0x1a8] sm:$0xff] }
  0x45   : > { %v261_v13 = vld [vmem:[%s1509_s28 + $0x1b8] sm:$0xff]  ;;  %v294_v16 = vpack.c.bf16 %v256_v11, %v254_v10  ;;  %v226_v18 = vld [vmem:[%s1509_s28 + $0xa0] sm:$0xff]  ;;  %v260_v23 = vld [vmem:[%s1509_s28 + $0x1b0] sm:$0xff] }
  0x46   : > { %v297_v17 = vpack.c.bf16 %v261_v13, %v259_v12  ;;  %v258_v22 = vld [vmem:[%s1509_s28 + $0x1a0] sm:$0xff]  ;;  %v263_v24 = vld [vmem:[%s1509_s28 + $0x1c8] sm:$0xff]  ;;  %v265_v25 = vld [vmem:[%s1509_s28 + $0x1d8] sm:$0xff] }
  0x47   : > { %1160 = vmatpush3.bf16.msra.mxu0 %v1329_v14  ;;  %1274 = vmatpush3.bf16.msra.mxu1 %v1329_v14  ;;  %v278_v14 = vpack.c.bf16 %v224_v7, %v222_v6  ;;  %v296_v28 = vpack.c.bf16 %v260_v23, %v258_v22  ;;  %v299_v29 = vpack.c.bf16 %v265_v25, %v263_v24  ;;  %v262_v34 = vld [vmem:[%s1509_s28 + $0x1c0] sm:$0xff]  ;;  %v264_v35 = vld [vmem:[%s1509_s28 + $0x1d0] sm:$0xff]  ;;  %v267_v36 = vld [vmem:[%s1509_s28 + $0x1e8] sm:$0xff] }
  0x48   : > { %1161 = vmatprep.subr.bf16.mxu0 %v1330_v15  ;;  %1267 = vmatprep.subr.bf16.mxu1 %v1330_v15  ;;  %v281_v15 = vpack.c.bf16 %v229_v9, %v227_v8  ;;  %v269_v37 = vld [vmem:[%s1509_s28 + $0x1f8] sm:$0xff]  ;;  %v298_v40 = vpack.c.bf16 %v264_v35, %v262_v34 }
  0x49   : > { %v301_v41 = vpack.c.bf16 %v269_v37, %v267_v36 }
  0x4b   : > { %1162 = vmatpush3.bf16.msra.mxu0 %v1331_v19  ;;  %1275 = vmatpush3.bf16.msra.mxu1 %v1331_v19  ;;  %v228_v19 = vld [vmem:[%s1509_s28 + $0xb0] sm:$0xff] }
  0x4c   : > { %1163 = vmatprep.subr.bf16.mxu0 %v1332_v20  ;;  %1268 = vmatprep.subr.bf16.mxu1 %v1332_v20  ;;  %v231_v20 = vld [vmem:[%s1509_s28 + $0xc8] sm:$0xff]  ;;  %v280_v26 = vpack.c.bf16 %v228_v19, %v226_v18 }
  0x4f   : > { %1164 = vmatpush3.bf16.msra.mxu0 %v1333_v21  ;;  %1276 = vmatpush3.bf16.msra.mxu1 %v1333_v21  ;;  %v233_v21 = vld [vmem:[%s1509_s28 + $0xd8] sm:$0xff] }
  0x50   : > { %v283_v27 = vpack.c.bf16 %v233_v21, %v231_v20 }
  0x52   : > { %463 = vmatmul.mubr.bf16.vlgmr.msra.gmra.mrb[0].mxu0 %v270_v30  ;;  %527 = vmatmul.mubr.bf16.vlgmr.msra.gmra.mrb[0].mxu1 %v286_v32  ;;  %v230_v30 = vld [vmem:[%s1509_s28 + $0xc0] sm:$0xff]  ;;  %v235_v32 = vld [vmem:[%s1509_s28 + $0xe8] sm:$0xff] }
  0x53   : > { %470 = vmatprep.mubr.bf16.mxu0 %v273_v31  ;;  %534 = vmatprep.mubr.bf16.mxu1 %v289_v33  ;;  %v232_v31 = vld [vmem:[%s1509_s28 + $0xd0] sm:$0xff]  ;;  %v237_v33 = vld [vmem:[%s1509_s28 + $0xf8] sm:$0xff] }
  0x54   : > { %v282_v38 = vpack.c.bf16 %v232_v31, %v230_v30  ;;  %v285_v39 = vpack.c.bf16 %v237_v33, %v235_v32 }
  0x5a   : > { %471 = vmatmul.mubr.bf16.gmra.mrb[4].mxu0 %v272_v42  ;;  %535 = vmatmul.mubr.bf16.gmra.mrb[4].mxu1 %v288_v44  ;;  %v234_v42 = vld [vmem:[%s1509_s28 + $0xe0] sm:$0xff] }
  0x5b   : > { %478 = vmatprep.mubr.bf16.mxu0 %v275_v43  ;;  %542 = vmatprep.mubr.bf16.mxu1 %v291_v45  ;;  %v236_v43 = vld [vmem:[%s1509_s28 + $0xf0] sm:$0xff]  ;;  %v266_v44 = vld [vmem:[%s1509_s28 + $0x1e0] sm:$0xff] }
  0x5c   : > { %v268_v45 = vld [vmem:[%s1509_s28 + $0x1f0] sm:$0xff]  ;;  %v284_v46 = vpack.c.bf16 %v236_v43, %v234_v42 }
  0x5d   : > { %v300_v47 = vpack.c.bf16 %v268_v45, %v266_v44 }
  0x62   : > { %479 = vmatmul.mubr.bf16.gmra.mrb[8].mxu0 %v274_v54  ;;  %543 = vmatmul.mubr.bf16.gmra.mrb[8].mxu1 %v290_v56 }
  0x63   : > { %486 = vmatprep.mubr.bf16.mxu0 %v277_v55  ;;  %550 = vmatprep.mubr.bf16.mxu1 %v293_v57 }
  0x6a   : > { %487 = vmatmul.mubr.bf16.gmra.mrb[12].mxu0 %v276_v2  ;;  %551 = vmatmul.mubr.bf16.gmra.mrb[12].mxu1 %v292_v4 }
  0x6b   : > { %494 = vmatprep.mubr.bf16.mxu0 %v279_v3  ;;  %558 = vmatprep.mubr.bf16.mxu1 %v295_v5 }
  0x72   : > { %495 = vmatmul.mubr.bf16.gmra.mrb[16].mxu0 %v278_v14  ;;  %559 = vmatmul.mubr.bf16.gmra.mrb[16].mxu1 %v294_v16 }
  0x73   : > { %502 = vmatprep.mubr.bf16.mxu0 %v281_v15  ;;  %566 = vmatprep.mubr.bf16.mxu1 %v297_v17 }
  0x7a   : > { %503 = vmatmul.mubr.bf16.gmra.mrb[20].mxu0 %v280_v26  ;;  %567 = vmatmul.mubr.bf16.gmra.mrb[20].mxu1 %v296_v28 }
  0x7b   : > { %510 = vmatprep.mubr.bf16.mxu0 %v283_v27  ;;  %574 = vmatprep.mubr.bf16.mxu1 %v299_v29 }
  0x82   : > { %511 = vmatmul.mubr.bf16.gmra.mrb[24].mxu0 %v282_v38  ;;  %575 = vmatmul.mubr.bf16.gmra.mrb[24].mxu1 %v298_v40 }
  0x83   : > { %518 = vmatprep.mubr.bf16.mxu0 %v285_v39  ;;  %582 = vmatprep.mubr.bf16.mxu1 %v301_v41 }
  0x8a   : > { %519 = vmatmul.mubr.bf16.gmra.mrb[28].mxu0 %v284_v46  ;;  %583 = vmatmul.mubr.bf16.gmra.mrb[28].mxu1 %v300_v47 }
 0x125   : > { %v1165_v48 = vpop.f32.mrb[0].mxu0  ;;  %v1213_v50 = vpop.f32.mrb[0].mxu1 }
 0x126   : > { %v1166_v49 = vpop.f32.mrb[1].mxu0  ;;  %v1214_v53 = vpop.f32.mrb[1].mxu1 }
 0x127   : > { %v1167_v51 = vadd.f32 %v1166_v49, %v1165_v48  ;;  %v1168_v52 = vpop.f32.mrb[2].mxu0  ;;  %v1628_v55 = vadd.f32 %v1214_v53, %v1213_v50  ;;  %v1216_v56 = vpop.f32.mrb[2].mxu1 }
 0x128   : > { %v1169_v54 = vpop.f32.mrb[3].mxu0  ;;  %v1217_v58 = vpop.f32.mrb[3].mxu1 }
 0x129   : > { %v1170_v57 = vadd.f32 %v1169_v54, %v1168_v52  ;;  %v1635_v59 = vadd.f32 %v1217_v58, %v1216_v56  ;;  %v789_v60 = vmul.f32 %v1167_v51, %v1167_v51 }
 0x12b   : > { %v1057_v61 = vpack.c.bf16 %v1170_v57, %v1167_v51  ;;  %v751_v62 = vadd.f32 %v1170_v57, %v1167_v51  ;;  %v790_v63 = vmul.f32 %v1170_v57, %v1170_v57  ;;  %v1097_v0 = vpack.c.bf16 %v1635_v59, %v1628_v55 }
 0x12d   : > { %1058 = vst [vmem:[%s1633_s18] sm:$0xff] %v1057_v61   ;;  %v821_v1 = vadd.f32 %v790_v63, %v789_v60  ;;  %v1171_v2 = vpop.f32.mrb[4].mxu0  ;;  %1141 = vst [vmem:[%s1633_s18 + $0x40] sm:$0xff] %v1097_v0   ;;  %v1219_v4 = vpop.f32.mrb[4].mxu1 }
 0x12e   : > { %v1172_v3 = vpop.f32.mrb[5].mxu0  ;;  %v1220_v7 = vpop.f32.mrb[5].mxu1 }
 0x12f   : > { %v1173_v5 = vadd.f32 %v1172_v3, %v1171_v2  ;;  %v1174_v6 = vpop.f32.mrb[6].mxu0  ;;  %v1641_v9 = vadd.f32 %v1220_v7, %v1219_v4  ;;  %v1222_v10 = vpop.f32.mrb[6].mxu1 }
 0x130   : > { %v1175_v8 = vpop.f32.mrb[7].mxu0  ;;  %v1223_v14 = vpop.f32.mrb[7].mxu1 }
 0x131   : > { %v752_v11 = vadd.f32 %v1173_v5, %v751_v62  ;;  %v791_v12 = vmul.f32 %v1173_v5, %v1173_v5  ;;  %v1176_v13 = vadd.f32 %v1175_v8, %v1174_v6  ;;  %v1643_v15 = vadd.f32 %v1223_v14, %v1222_v10 }
 0x133   : > { %v822_v16 = vadd.f32 %v821_v1, %v791_v12  ;;  %v1062_v17 = vpack.c.bf16 %v1176_v13, %v1173_v5  ;;  %v753_v18 = vadd.f32 %v1176_v13, %v752_v11  ;;  %v792_v19 = vmul.f32 %v1176_v13, %v1176_v13 }
 0x134   : > { %v1102_v20 = vpack.c.bf16 %v1643_v15, %v1641_v9 }
 0x135   : > { %1134 = vst [vmem:[%s1633_s18 + $0x8] sm:$0xff] %v1062_v17   ;;  %v823_v21 = vadd.f32 %v822_v16, %v792_v19  ;;  %v1177_v22 = vpop.f32.mrb[8].mxu0  ;;  %v1225_v24 = vpop.f32.mrb[8].mxu1 }
 0x136   : > { %v1178_v23 = vpop.f32.mrb[9].mxu0  ;;  %1142 = vst [vmem:[%s1633_s18 + $0x48] sm:$0xff] %v1102_v20   ;;  %v1226_v27 = vpop.f32.mrb[9].mxu1 }
 0x137   : > { %v1179_v25 = vadd.f32 %v1178_v23, %v1177_v22  ;;  %v1180_v26 = vpop.f32.mrb[10].mxu0  ;;  %v1649_v29 = vadd.f32 %v1226_v27, %v1225_v24  ;;  %v1228_v30 = vpop.f32.mrb[10].mxu1 }
 0x138   : > { %v1181_v28 = vpop.f32.mrb[11].mxu0  ;;  %v1229_v34 = vpop.f32.mrb[11].mxu1 }
 0x139   : > { %v754_v31 = vadd.f32 %v1179_v25, %v753_v18  ;;  %v793_v32 = vmul.f32 %v1179_v25, %v1179_v25  ;;  %v1182_v33 = vadd.f32 %v1181_v28, %v1180_v26  ;;  %v1651_v35 = vadd.f32 %v1229_v34, %v1228_v30 }
 0x13b   : > { %v824_v36 = vadd.f32 %v823_v21, %v793_v32  ;;  %v1067_v37 = vpack.c.bf16 %v1182_v33, %v1179_v25  ;;  %v755_v38 = vadd.f32 %v1182_v33, %v754_v31  ;;  %v794_v39 = vmul.f32 %v1182_v33, %v1182_v33 }
 0x13c   : > { %v1107_v40 = vpack.c.bf16 %v1651_v35, %v1649_v29 }
 0x13d   : > { %1135 = vst [vmem:[%s1633_s18 + $0x10] sm:$0xff] %v1067_v37   ;;  %v825_v41 = vadd.f32 %v824_v36, %v794_v39  ;;  %v1183_v42 = vpop.f32.mrb[12].mxu0  ;;  %v1231_v44 = vpop.f32.mrb[12].mxu1 }
 0x13e   : > { %v1184_v43 = vpop.f32.mrb[13].mxu0  ;;  %1143 = vst [vmem:[%s1633_s18 + $0x50] sm:$0xff] %v1107_v40   ;;  %v1232_v47 = vpop.f32.mrb[13].mxu1 }
 0x13f   : > { %v1185_v45 = vadd.f32 %v1184_v43, %v1183_v42  ;;  %v1186_v46 = vpop.f32.mrb[14].mxu0  ;;  %v1657_v49 = vadd.f32 %v1232_v47, %v1231_v44  ;;  %v1234_v50 = vpop.f32.mrb[14].mxu1 }
 0x140   : > { %v1187_v48 = vpop.f32.mrb[15].mxu0  ;;  %v1235_v54 = vpop.f32.mrb[15].mxu1 }
 0x141   : > { %v756_v51 = vadd.f32 %v1185_v45, %v755_v38  ;;  %v795_v52 = vmul.f32 %v1185_v45, %v1185_v45  ;;  %v1188_v53 = vadd.f32 %v1187_v48, %v1186_v46  ;;  %v1659_v56 = vadd.f32 %v1235_v54, %v1234_v50 }
 0x143   : > { %v826_v57 = vadd.f32 %v825_v41, %v795_v52  ;;  %v1072_v58 = vpack.c.bf16 %v1188_v53, %v1185_v45  ;;  %v757_v60 = vadd.f32 %v1188_v53, %v756_v51  ;;  %v796_v61 = vmul.f32 %v1188_v53, %v1188_v53 }
 0x144   : > { %v1112_v62 = vpack.c.bf16 %v1659_v56, %v1657_v49 }
 0x145   : > { %1136 = vst [vmem:[%s1633_s18 + $0x18] sm:$0xff] %v1072_v58   ;;  %v827_v63 = vadd.f32 %v826_v57, %v796_v61  ;;  %v1189_v0 = vpop.f32.mrb[16].mxu0  ;;  %v1237_v2 = vpop.f32.mrb[16].mxu1 }
 0x146   : > { %v1190_v1 = vpop.f32.mrb[17].mxu0  ;;  %1144 = vst [vmem:[%s1633_s18 + $0x58] sm:$0xff] %v1112_v62   ;;  %v1238_v5 = vpop.f32.mrb[17].mxu1 }
 0x147   : > { %v1191_v3 = vadd.f32 %v1190_v1, %v1189_v0  ;;  %v1192_v4 = vpop.f32.mrb[18].mxu0  ;;  %v1665_v7 = vadd.f32 %v1238_v5, %v1237_v2  ;;  %v1240_v8 = vpop.f32.mrb[18].mxu1 }
 0x148   : > { %v1193_v6 = vpop.f32.mrb[19].mxu0  ;;  %v1241_v13 = vpop.f32.mrb[19].mxu1 }
 0x149   : > { %v758_v10 = vadd.f32 %v1191_v3, %v757_v60  ;;  %v797_v11 = vmul.f32 %v1191_v3, %v1191_v3  ;;  %v1194_v12 = vadd.f32 %v1193_v6, %v1192_v4  ;;  %v1667_v14 = vadd.f32 %v1241_v13, %v1240_v8 }
 0x14b   : > { %v828_v16 = vadd.f32 %v827_v63, %v797_v11  ;;  %v1077_v17 = vpack.c.bf16 %v1194_v12, %v1191_v3  ;;  %v759_v18 = vadd.f32 %v1194_v12, %v758_v10  ;;  %v798_v19 = vmul.f32 %v1194_v12, %v1194_v12 }
 0x14c   : > { %v1117_v20 = vpack.c.bf16 %v1667_v14, %v1665_v7 }
 0x14d   : > { %1137 = vst [vmem:[%s1633_s18 + $0x20] sm:$0xff] %v1077_v17   ;;  %v829_v21 = vadd.f32 %v828_v16, %v798_v19  ;;  %v1195_v22 = vpop.f32.mrb[20].mxu0  ;;  %v1243_v24 = vpop.f32.mrb[20].mxu1 }
 0x14e   : > { %v1196_v23 = vpop.f32.mrb[21].mxu0  ;;  %1145 = vst [vmem:[%s1633_s18 + $0x60] sm:$0xff] %v1117_v20   ;;  %v1244_v27 = vpop.f32.mrb[21].mxu1 }
 0x14f   : > { %v1197_v25 = vadd.f32 %v1196_v23, %v1195_v22  ;;  %v1198_v26 = vpop.f32.mrb[22].mxu0  ;;  %v1673_v30 = vadd.f32 %v1244_v27, %v1243_v24  ;;  %v1246_v31 = vpop.f32.mrb[22].mxu1  ;;  %v805_v27 = vmul.f32 %v1628_v55, %v1628_v55 }
 0x150   : > { %v1199_v28 = vpop.f32.mrb[23].mxu0  ;;  %v1247_v36 = vpop.f32.mrb[23].mxu1 }
 0x151   : > { %v760_v32 = vadd.f32 %v1197_v25, %v759_v18  ;;  %v799_v33 = vmul.f32 %v1197_v25, %v1197_v25  ;;  %v1200_v34 = vadd.f32 %v1199_v28, %v1198_v26  ;;  %v1675_v37 = vadd.f32 %v1247_v36, %v1246_v31 }
 0x152   : > { %v807_v36 = vmul.f32 %v1641_v9, %v1641_v9 }
 0x153   : > { %v830_v38 = vadd.f32 %v829_v21, %v799_v33  ;;  %v1082_v39 = vpack.c.bf16 %v1200_v34, %v1197_v25  ;;  %v761_v40 = vadd.f32 %v1200_v34, %v760_v32  ;;  %v800_v41 = vmul.f32 %v1200_v34, %v1200_v34 }
 0x154   : > { %v1122_v42 = vpack.c.bf16 %v1675_v37, %v1673_v30  ;;  %v806_v32 = vmul.f32 %v1635_v59, %v1635_v59 }
 0x155   : > { %1138 = vst [vmem:[%s1633_s18 + $0x28] sm:$0xff] %v1082_v39   ;;  %v831_v43 = vadd.f32 %v830_v38, %v800_v41  ;;  %v1201_v44 = vpop.f32.mrb[24].mxu0  ;;  %v1249_v46 = vpop.f32.mrb[24].mxu1 }
 0x156   : > { %v1202_v45 = vpop.f32.mrb[25].mxu0  ;;  %1146 = vst [vmem:[%s1633_s18 + $0x68] sm:$0xff] %v1122_v42   ;;  %v1250_v50 = vpop.f32.mrb[25].mxu1  ;;  %v809_v42 = vmul.f32 %v1649_v29, %v1649_v29 }
 0x157   : > { %v1203_v47 = vadd.f32 %v1202_v45, %v1201_v44  ;;  %v1204_v48 = vpop.f32.mrb[26].mxu0  ;;  %v1681_v52 = vadd.f32 %v1250_v50, %v1249_v46  ;;  %v1252_v53 = vpop.f32.mrb[26].mxu1 }
 0x158   : > { %v1205_v51 = vpop.f32.mrb[27].mxu0  ;;  %v1253_v60 = vpop.f32.mrb[27].mxu1 }
 0x159   : > { %v762_v54 = vadd.f32 %v1203_v47, %v761_v40  ;;  %v801_v57 = vmul.f32 %v1203_v47, %v1203_v47  ;;  %v1206_v58 = vadd.f32 %v1205_v51, %v1204_v48  ;;  %v1683_v61 = vadd.f32 %v1253_v60, %v1252_v53 }
 0x15a   : > { %v808_v40 = vmul.f32 %v1643_v15, %v1643_v15  ;;  %v813_v53 = vmul.f32 %v1665_v7, %v1665_v7 }
 0x15b   : > { %v832_v62 = vadd.f32 %v831_v43, %v801_v57  ;;  %v1087_v63 = vpack.c.bf16 %v1206_v58, %v1203_v47  ;;  %v763_v0 = vadd.f32 %v1206_v58, %v762_v54  ;;  %v802_v1 = vmul.f32 %v1206_v58, %v1206_v58 }
 0x15c   : > { %v1127_v2 = vpack.c.bf16 %v1683_v61, %v1681_v52  ;;  %v814_v58 = vmul.f32 %v1667_v14, %v1667_v14 }
 0x15d   : > { %1139 = vst [vmem:[%s1633_s18 + $0x30] sm:$0xff] %v1087_v63   ;;  %v833_v3 = vadd.f32 %v832_v62, %v802_v1  ;;  %v1207_v4 = vpop.f32.mrb[28].mxu0  ;;  %v1255_v6 = vpop.f32.mrb[28].mxu1 }
 0x15e   : > { %v1208_v5 = vpop.f32.mrb[29].mxu0  ;;  %1147 = vst [vmem:[%s1633_s18 + $0x70] sm:$0xff] %v1127_v2   ;;  %v1256_v11 = vpop.f32.mrb[29].mxu1 }
 0x15f   : > { %v1209_v8 = vadd.f32 %v1208_v5, %v1207_v4  ;;  %v1210_v10 = vpop.f32.mrb[30].mxu0  ;;  %v1257_v13 = vadd.f32 %v1256_v11, %v1255_v6  ;;  %v1258_v16 = vpop.f32.mrb[30].mxu1  ;;  %v818_v4 = vmul.f32 %v1683_v61, %v1683_v61 }
 0x160   : > { %v1211_v12 = vpop.f32.mrb[31].mxu0  ;;  %v1259_v20 = vpop.f32.mrb[31].mxu1 }
 0x161   : > { %v764_v17 = vadd.f32 %v1209_v8, %v763_v0  ;;  %v803_v18 = vmul.f32 %v1209_v8, %v1209_v8  ;;  %v1212_v19 = vadd.f32 %v1211_v12, %v1210_v10  ;;  %v1260_v21 = vadd.f32 %v1259_v20, %v1258_v16 }
 0x163   : > { %v834_v22 = vadd.f32 %v833_v3, %v803_v18  ;;  %v1092_v23 = vpack.c.bf16 %v1212_v19, %v1209_v8  ;;  %v765_v24 = vadd.f32 %v1212_v19, %v764_v17  ;;  %v804_v25 = vmul.f32 %v1212_v19, %v1212_v19 }
 0x164   : > { %v1132_v26 = vpack.c.bf16 %v1260_v21, %v1257_v13 }
 0x165   : > { %1140 = vst [vmem:[%s1633_s18 + $0x38] sm:$0xff] %v1092_v23   ;;  %v766_v28 = vadd.f32 %v1628_v55, %v765_v24  ;;  %v835_v31 = vadd.f32 %v834_v22, %v804_v25 }
 0x166   : > { %1148 = vst [vmem:[%s1633_s18 + $0x78] sm:$0xff] %v1132_v26  }
 0x167   : > { %v767_v33 = vadd.f32 %v1635_v59, %v766_v28  ;;  %v836_v34 = vadd.f32 %v835_v31, %v805_v27  ;;  %v810_v59 = vmul.f32 %v1651_v35, %v1651_v35 }
 0x169   : > { %v768_v38 = vadd.f32 %v1641_v9, %v767_v33  ;;  %v837_v39 = vadd.f32 %v836_v34, %v806_v32  ;;  %v811_v9 = vmul.f32 %v1657_v49, %v1657_v49 }
 0x16b   : > { %v769_v41 = vadd.f32 %v1643_v15, %v768_v38  ;;  %v838_v55 = vadd.f32 %v837_v39, %v807_v36  ;;  %v812_v15 = vmul.f32 %v1659_v56, %v1659_v56 }
 0x16d   : > { %v839_v43 = vadd.f32 %v838_v55, %v808_v40  ;;  %v770_v44 = vadd.f32 %v1649_v29, %v769_v41 }
 0x16f   : > { %v771_v45 = vadd.f32 %v1651_v35, %v770_v44  ;;  %v840_v46 = vadd.f32 %v839_v43, %v809_v42 }
 0x171   : > { %v772_v47 = vadd.f32 %v1657_v49, %v771_v45  ;;  %v841_v48 = vadd.f32 %v840_v46, %v810_v59 }
 0x173   : > { %v773_v50 = vadd.f32 %v1659_v56, %v772_v47  ;;  %v842_v51 = vadd.f32 %v841_v48, %v811_v9  ;;  %v815_v56 = vmul.f32 %v1673_v30, %v1673_v30 }
 0x175   : > { %v774_v29 = vadd.f32 %v1665_v7, %v773_v50  ;;  %v843_v54 = vadd.f32 %v842_v51, %v812_v15  ;;  %v816_v7 = vmul.f32 %v1675_v37, %v1675_v37 }
 0x177   : > { %v844_v35 = vadd.f32 %v843_v54, %v813_v53  ;;  %v775_v57 = vadd.f32 %v1667_v14, %v774_v29  ;;  %v817_v14 = vmul.f32 %v1681_v52, %v1681_v52 }
 0x179   : > { %v845_v49 = vadd.f32 %v844_v35, %v814_v58  ;;  %v776_v60 = vadd.f32 %v1673_v30, %v775_v57  ;;  %v819_v30 = vmul.f32 %v1257_v13, %v1257_v13 }
 0x17b   : > { %v846_v62 = vadd.f32 %v845_v49, %v815_v56  ;;  %v777_v63 = vadd.f32 %v1675_v37, %v776_v60  ;;  %v820_v37 = vmul.f32 %v1260_v21, %v1260_v21 }
 0x17d   : > { %v847_v0 = vadd.f32 %v846_v62, %v816_v7  ;;  %v778_v1 = vadd.f32 %v1681_v52, %v777_v63 }
 0x17f   : > { %v848_v2 = vadd.f32 %v847_v0, %v817_v14  ;;  %v779_v3 = vadd.f32 %v1683_v61, %v778_v1 }
 0x181   : > { %v849_v5 = vadd.f32 %v848_v2, %v818_v4  ;;  %v780_v6 = vadd.f32 %v1257_v13, %v779_v3 }
 0x183   : > { %v850_v8 = vadd.f32 %v849_v5, %v819_v30  ;;  %v781_v10 = vadd.f32 %v1260_v21, %v780_v6 }
 0x185   : > { %v782_v11 = vrot.slane %v781_v10, 4  ;;  %v851_v12 = vadd.f32 %v850_v8, %v820_v37 }
 0x187   : > { %v783_v16 = vadd.f32 %v782_v11, %v781_v10  ;;  %v852_v17 = vrot.slane %v851_v12, 4 }
 0x189   : > { %v784_v18 = vrot.slane %v783_v16, 2  ;;  %v853_v52 = vadd.f32 %v852_v17, %v851_v12 }
 0x18b   : > { %v785_v19 = vadd.f32 %v784_v18, %v783_v16  ;;  %v854_v20 = vrot.slane %v853_v52, 2 }
 0x18d   : > { %v786_v22 = vrot.slane %v785_v19, 1  ;;  %v855_v23 = vadd.f32 %v854_v20, %v853_v52 }
 0x18f   : > { %v787_v61 = vadd.f32 %v786_v22, %v785_v19  ;;  %v856_v13 = vrot.slane %v855_v23, 1 }
 0x191   : > { %788 = vst [vmem:[%s204_s24] sm:$0x1] %v787_v61  ;;  %v857_v21 = vadd.f32 %v856_v13, %v855_v23 }
 0x193   : > { %858 = vst [vmem:[%s204_s24 + $0x1] sm:$0x1] %v857_v21 }
 0x194 PF: > { %p14_p9 = scmp.ge.s32.totalorder %s1445_s17, 4   ;;  %s1758_s12 = smov %s1390_s13 }
 0x195   : > { %s1759_s13 = smov %s1394_s14  ;;  %s1760_s14 = smov %s1455_s20 }
 0x196   : > { %s1761_s15 = smov %s1445_s17  ;;  %16 = sbr.rel (!%p14_p9) target bundleno = 3 (0x3), region = 80 }
 0x19d   :  { %895 = vsyncpa [#allocation3], 1 }
 0x19e   :  { %897 = vsyncpa [#allocation3 + $0x1], 1 }

</bundles_post_ra>
